<compile_context>
chip_gen: v7x
topology: tpu7x:2x2x1
jax: 0.10.0
libtpu: 0.0.40
codegen_flags: <defaults>
</compile_context>

<pallas_src>
import functools
import math

import jax
import jax.numpy as jnp
from jax import lax
from jax.experimental import pallas as pl
from jax.experimental.pallas import tpu as pltpu


# Row indices inside the packed (L, 16, D) per-layer vector slab.
_G1, _B1, _BQ, _BK, _BV, _BO, _G2, _B2, _BM2 = range(9)
_VEC_ROWS = 16  # padded to a sublane-friendly count


def _layernorm(v, g, b, eps=1e-5):
    mu = jnp.mean(v, axis=-1, keepdims=True)
    var = jnp.mean((v - mu) ** 2, axis=-1, keepdims=True)
    return (v - mu) * lax.rsqrt(var + eps) * g + b


def _gelu_exact(v):  # matches nn.GELU() (approximate='none')
    return 0.5 * v * (1.0 + lax.erf(v * (1.0 / math.sqrt(2.0))))


# ---------------------------------------------------------------------------
# Fused Pallas kernel: one (batch-chunk, layer) grid step
# ---------------------------------------------------------------------------
def fused_transformer_kernel(
    x_ref, y_ref, mask_ref,
    wq_ref,                    # (1, D, D)   scale folded in
    wkv_ref,                   # (1, D, 2D)  [wk | wv]
    wo_ref,                    # (1, D, D)
    w1_ref, w2_ref,            # (1, D, M), (1, M, D)
    vd_ref,                    # (1, 16, D)  packed D-wide vectors (f32)
    vm_ref,                    # (1, 1, M)   bm1 (f32)
    out_ref,                   # (Bt, Lq, D) resident activation (f32)
    ctx_sc,                    # VMEM scratch (Bt*Lq, D) f32
    *, num_heads, mlp_block):
    layer = pl.program_id(1)

    Bt, Lq, D = out_ref.shape
    Lk = y_ref.shape[1]
    H = num_heads
    hd = D // H
    f32 = jnp.float32
    cdt = wq_ref.dtype                     # matmul input dtype (f32 or bf16)

    # First layer: load the input activation into the resident output block.
    @pl.when(layer == 0)
    def _():
        out_ref[...] = x_ref[...]

    vd = vd_ref[0]                         # (16, D) per-layer vectors
    bm1 = vm_ref[0, 0]                     # (M,)

    x3 = out_ref[...]                      # (Bt, Lq, D) current activation
    x2 = x3.reshape(Bt * Lq, D)
    y2 = y_ref[...].reshape(Bt * Lk, D)
    m3 = mask_ref[...]                     # (Bt, Lq, 1)

    # --- LayerNorm(query) * mask (f32 elementwise) ---
    nq = (_layernorm(x3, vd[_G1], vd[_B1]) * m3).reshape(Bt * Lq, D)

    nq_c = nq.astype(cdt)
    y_c = y2.astype(cdt)

    # --- Fused projections: full-width MXU matmuls, f32 accumulate ---
    q2 = jnp.dot(nq_c, wq_ref[0], preferred_element_type=f32) + vd[_BQ]
    kv2 = jnp.dot(y_c, wkv_ref[0], preferred_element_type=f32)   # (Bt*Lk, 2D)
    k2 = kv2[:, :D] + vd[_BK]
    v2 = kv2[:, D:] + vd[_BV]

    # --- Per-head attention (3-D einsums, batch = Bt); context heads are
    #     written into contiguous lane slices of a VMEM scratch so the output
    #     projection below is ONE full-width matmul. ---
    for h in range(H):                     # static unroll over heads
        lo = h * hd
        qh = q2[:, lo:lo + hd].reshape(Bt, Lq, hd).astype(cdt)
        kh = k2[:, lo:lo + hd].reshape(Bt, Lk, hd).astype(cdt)
        vh = v2[:, lo:lo + hd].reshape(Bt, Lk, hd).astype(cdt)
        s = jnp.einsum('bqd,bkd->bqk', qh, kh, preferred_element_type=f32)
        s = s - jnp.max(s, axis=-1, keepdims=True)
        p = jnp.exp(s)
        p = p * pl.reciprocal(jnp.sum(p, axis=-1, keepdims=True), approx=True)
        ctx = jnp.einsum('bqk,bkd->bqd', p.astype(cdt), vh,
                         preferred_element_type=f32)             # (Bt, Lq, hd)
        ctx_sc[:, lo:lo + hd] = ctx.reshape(Bt * Lq, hd)

    attn = jnp.dot(ctx_sc[...].astype(cdt), wo_ref[0],
                   preferred_element_type=f32) + vd[_BO]

    # --- residual 1 ---
    xr = x2 + attn

    # --- LayerNorm + MLP (exact GELU), tiled along hidden dim M ---
    n2 = _layernorm(xr, vd[_G2], vd[_B2]).astype(cdt)
    M = w1_ref.shape[2]
    tM = min(mlp_block, M)
    acc = xr
    for c in range(pl.cdiv(M, tM)):        # static chunk loop
        lo = c * tM
        hi = min(lo + tM, M)
        hid = (jnp.dot(n2, w1_ref[0, :, lo:hi], preferred_element_type=f32)
               + bm1[lo:hi])
        hid = _gelu_exact(hid)
        acc = acc + jnp.dot(hid.astype(cdt), w2_ref[0, lo:hi, :],
                            preferred_element_type=f32)

    # --- residual 2: update resident activation (HBM writeback only at end) --
    out_ref[...] = (acc + vd[_BM2]).reshape(Bt, Lq, D)


# ---------------------------------------------------------------------------
# Host-side parameter packing: stack layers, fuse K/V, fold the q scale,
# pack the small vectors into two lane-dense slabs.
# ---------------------------------------------------------------------------
def pack_params(layer_params, num_heads, compute_dtype=jnp.float32):
    L = len(layer_params)
    D = layer_params[0]["wq"].shape[0]
    M = layer_params[0]["w1"].shape[1]
    hd = D // num_heads
    scale = 1.0 / math.sqrt(hd)

    def stack(name):
        return jnp.stack([p[name] for p in layer_params]).astype(jnp.float32)

    rows = [stack("g1"), stack("b1"), stack("bq") * scale, stack("bk"),
            stack("bv"), stack("bo"), stack("g2"), stack("b2"), stack("bm2")]
    vec_d = jnp.zeros((L, _VEC_ROWS, D), jnp.float32)
    for i, r in enumerate(rows):
        vec_d = vec_d.at[:, i, :].set(r.reshape(L, D))

    return dict(
        wq=(stack("wq") * scale).astype(compute_dtype),                 # (L, D, D)
        wkv=jnp.concatenate([stack("wk"), stack("wv")], axis=-1
                            ).astype(compute_dtype),                    # (L, D, 2D)
        wo=stack("wo").astype(compute_dtype),                           # (L, D, D)
        w1=stack("w1").astype(compute_dtype),                           # (L, D, M)
        w2=stack("w2").astype(compute_dtype),                           # (L, M, D)
        vec_d=vec_d,                                                    # (L, 16, D)
        vec_m=stack("bm1").reshape(L, 1, M),                            # (L, 1, M)
    )


def _vmem_limit_bytes(Bt, Lq, Lk, D, M, tM, w_itemsize):
    """Rough per-step working-set estimate -> explicit scoped-VMEM limit."""
    weights = (D * D + 2 * D * D + D * D + D * M + M * D) * w_itemsize \
        + (_VEC_ROWS * D + M) * 4
    blocks = (2 * Bt * Lq * D + Bt * Lk * D + Bt * Lq) * 4      # out, x, y, mask
    temps = (6 * Bt * Lq * D + 3 * Bt * Lk * D + Bt * Lq * Lk + Bt * Lq * tM) * 4
    est = 2 * (weights + blocks) + temps                         # double-buffering
    # Clamp: safe on v7x (64 MiB physical); on v5e/v6e (128 MiB) this can be
    # raised to ~100 MiB for larger batch blocks.
    return int(min(max(2 * est, 32 * 1024 * 1024), 64 * 1024 * 1024))


# ---------------------------------------------------------------------------
# Wrapper: whole transformer in ONE pallas_call
#   grid = (batch_chunks [parallel], num_layers [arbitrary])
#   batch_block: v5e/v6e -> None (Bt = B, weights streamed once);
#                v7x     -> choose so B // Bt >= 2 (one chunk per TensorCore).
# ---------------------------------------------------------------------------
def cross_attention_transformer(x, y, mask, packed, num_heads, *,
                                batch_block=None, mlp_block=512):
    B, Lq, D = x.shape
    Lk = y.shape[1]
    L, _, M = packed["w1"].shape
    H = num_heads

    if mask is None:
        mask = jnp.ones((B, Lq), jnp.float32)
    mask3 = mask[..., None].astype(jnp.float32)          # (B, Lq, 1)

    Bt = B if batch_block is None else batch_block
    assert B % Bt == 0, "batch must be divisible by batch_block"
    tM = min(mlp_block, M)

    def wspec(shape):  # per-layer weight block: walks the leading layer axis
        return pl.BlockSpec((1,) + shape, lambda b, l: (l,) + (0,) * len(shape))

    in_specs = [
        pl.BlockSpec((Bt, Lq, D), lambda b, l: (b, 0, 0)),   # x (used at layer 0)
        pl.BlockSpec((Bt, Lk, D), lambda b, l: (b, 0, 0)),   # y
        pl.BlockSpec((Bt, Lq, 1), lambda b, l: (b, 0, 0)),   # mask
        wspec((D, D)),                                       # wq
        wspec((D, 2 * D)),                                   # wkv
        wspec((D, D)),                                       # wo
        wspec((D, M)), wspec((M, D)),                        # w1, w2
        wspec((_VEC_ROWS, D)),                               # packed D-wide vectors
        wspec((1, M)),                                       # bm1
    ]
    # Output block index constant along the layer axis -> resident accumulator,
    # written to HBM once per batch chunk.
    out_spec = pl.BlockSpec((Bt, Lq, D), lambda b, l: (b, 0, 0))

    kernel = functools.partial(fused_transformer_kernel,
                               num_heads=H, mlp_block=mlp_block)
    return pl.pallas_call(
        kernel,
        out_shape=jax.ShapeDtypeStruct((B, Lq, D), jnp.float32),
        grid=(B // Bt, L),
        in_specs=in_specs,
        out_specs=out_spec,
        scratch_shapes=[pltpu.VMEM((Bt * Lq, D), jnp.float32)],
        compiler_params=pltpu.CompilerParams(
            dimension_semantics=("parallel", "arbitrary"),
            vmem_limit_bytes=_vmem_limit_bytes(
                Bt, Lq, Lk, D, M, tM, jnp.dtype(packed["wq"].dtype).itemsize)),
    )(x, y, mask3,
      packed["wq"], packed["wkv"], packed["wo"],
      packed["w1"], packed["w2"],
      packed["vec_d"], packed["vec_m"])


# ---------------------------------------------------------------------------
# Pure-JAX reference (correctness check)
# ---------------------------------------------------------------------------
def layer_ref(x, y, mask, p, H):
    def ln(v, g, b):
        mu = v.mean(-1, keepdims=True)
        var = ((v - mu) ** 2).mean(-1, keepdims=True)
        return (v - mu) / jnp.sqrt(var + 1e-5) * g + b

    nq = ln(x, p["g1"], p["b1"]) * mask[..., None]
    q = nq @ p["wq"] + p["bq"]
    k = y @ p["wk"] + p["bk"]
    v = y @ p["wv"] + p["bv"]
    B, Lq, D = q.shape
    Lk = k.shape[1]
    hd = D // H
    qh = q.reshape(B, Lq, H, hd).transpose(0, 2, 1, 3)
    kh = k.reshape(B, Lk, H, hd).transpose(0, 2, 1, 3)
    vh = v.reshape(B, Lk, H, hd).transpose(0, 2, 1, 3)
    s = jnp.einsum("bhqd,bhkd->bhqk", qh, kh) / jnp.sqrt(jnp.float32(hd))
    pw = jax.nn.softmax(s, axis=-1)
    ctx = jnp.einsum("bhqk,bhkd->bhqd", pw, vh).transpose(0, 2, 1, 3).reshape(B, Lq, D)
    attn = ctx @ p["wo"] + p["bo"]
    xr = x + attn
    n2 = ln(xr, p["g2"], p["b2"])
    h = jax.nn.gelu(n2 @ p["w1"] + p["bm1"], approximate=False)
    return xr + h @ p["w2"] + p["bm2"]


def transformer_ref(x, y, mask, layer_params, H):
    for p in layer_params:
        x = layer_ref(x, y, mask, p, H)
    return x


# ---------------------------------------------------------------------------
# Deterministic parameter init
# ---------------------------------------------------------------------------
def init_layer_params(key, D, M):
    ks = jax.random.split(key, 10)
    std = 0.05
    return {
        "g1": jnp.ones((1, D), jnp.float32),
        "b1": jnp.zeros((1, D), jnp.float32),
        "wq": std * jax.random.normal(ks[0], (D, D), jnp.float32),
        "wk": std * jax.random.normal(ks[1], (D, D), jnp.float32),
        "wv": std * jax.random.normal(ks[2], (D, D), jnp.float32),
        "bq": std * jax.random.normal(ks[3], (1, D), jnp.float32),
        "bk": std * jax.random.normal(ks[4], (1, D), jnp.float32),
        "bv": std * jax.random.normal(ks[5], (1, D), jnp.float32),
        "wo": std * jax.random.normal(ks[6], (D, D), jnp.float32),
        "bo": jnp.zeros((1, D), jnp.float32),
        "g2": jnp.ones((1, D), jnp.float32),
        "b2": jnp.zeros((1, D), jnp.float32),
        "w1": std * jax.random.normal(ks[7], (D, M), jnp.float32),
        "bm1": std * jax.random.normal(ks[8], (1, M), jnp.float32),
        "w2": std * jax.random.normal(ks[9], (M, D), jnp.float32),
        "bm2": jnp.zeros((1, D), jnp.float32),
    }


if __name__ == "__main__":
    B, Lq, Lk = 2, 8, 8
    D, H, M = 32, 4, 64          # token_dim, num_heads, mlp_dim
    num_layers = 2

    key = jax.random.PRNGKey(0)
    kx, ky, km, kp = jax.random.split(key, 4)
    x = jax.random.normal(kx, (B, Lq, D), jnp.float32)
    y = jax.random.normal(ky, (B, Lk, D), jnp.float32)
    mask = (jax.random.uniform(km, (B, Lq)) > 0.3).astype(jnp.float32)

    layer_keys = jax.random.split(kp, num_layers)
    layer_params = [init_layer_params(k, D, M) for k in layer_keys]

    ref = jax.block_until_ready(transformer_ref(x, y, mask, layer_params, H))

    # f32 matmul path (approx EUP reciprocal in the softmax -> tight-ish check).
    packed_f32 = pack_params(layer_params, H, compute_dtype=jnp.float32)
    out_f32 = jax.block_until_ready(
        cross_attention_transformer(x, y, mask, packed_f32, H))
    assert jnp.allclose(out_f32, ref, rtol=2e-3, atol=2e-3), \
        "f32 kernel mismatch vs pure-JAX reference"

    # bf16 matmul path (fast MXU path on v6e/v7x, f32 accumulate): loose check.
    packed_bf16 = pack_params(layer_params, H, compute_dtype=jnp.bfloat16)
    out_bf16 = jax.block_until_ready(
        cross_attention_transformer(x, y, mask, packed_bf16, H))
    assert jnp.allclose(out_bf16, ref, rtol=5e-2, atol=5e-2), \
        "bf16 kernel mismatch vs pure-JAX reference"

    print("KERNEL_OK")
</pallas_src>

<mosaic_0001>
module attributes {stable_mosaic.version = 11 : i64} {
  func.func @fused_transformer_kernel(%arg0: i32, %arg1: i32, %arg2: memref<2x8x32xf32, #tpu.memory_space<vmem>>, %arg3: memref<2x8x32xf32, #tpu.memory_space<vmem>>, %arg4: memref<2x8x1xf32, #tpu.memory_space<vmem>>, %arg5: memref<1x32x32xf32, #tpu.memory_space<vmem>>, %arg6: memref<1x32x64xf32, #tpu.memory_space<vmem>>, %arg7: memref<1x32x32xf32, #tpu.memory_space<vmem>>, %arg8: memref<1x32x64xf32, #tpu.memory_space<vmem>>, %arg9: memref<1x64x32xf32, #tpu.memory_space<vmem>>, %arg10: memref<1x16x32xf32, #tpu.memory_space<vmem>>, %arg11: memref<1x1x64xf32, #tpu.memory_space<vmem>>, %arg12: memref<2x8x32xf32, #tpu.memory_space<vmem>>, %arg13: memref<16x32xf32, #tpu.memory_space<vmem>>) attributes {dimension_semantics = [#tpu.dimension_semantics<parallel>, #tpu.dimension_semantics<arbitrary>], iteration_bounds = array<i64: 1, 2>, scalar_prefetch = 0 : i64, scratch_operands = 1 : i64, tpu.core_type = #tpu.core_type<tc>, window_params = [{transform_indices = @transform_0, window_bounds = array<i64: 2, 8, 32>}, {transform_indices = @transform_1, window_bounds = array<i64: 2, 8, 32>}, {transform_indices = @transform_2, window_bounds = array<i64: 2, 8, 1>}, {transform_indices = @transform_3, window_bounds = array<i64: 1, 32, 32>}, {transform_indices = @transform_4, window_bounds = array<i64: 1, 32, 64>}, {transform_indices = @transform_5, window_bounds = array<i64: 1, 32, 32>}, {transform_indices = @transform_6, window_bounds = array<i64: 1, 32, 64>}, {transform_indices = @transform_7, window_bounds = array<i64: 1, 64, 32>}, {transform_indices = @transform_8, window_bounds = array<i64: 1, 16, 32>}, {transform_indices = @transform_9, window_bounds = array<i64: 1, 1, 64>}, {transform_indices = @transform_10, window_bounds = array<i64: 2, 8, 32>}]} {
    %c0_i32 = arith.constant 0 : i32
    %0 = arith.cmpi eq, %arg1, %c0_i32 : i32
    %1 = arith.extui %0 : i1 to i32
    %c0_i32_0 = arith.constant 0 : i32
    %2 = arith.cmpi ne, %1, %c0_i32_0 : i32
    scf.if %2 {
      %c0_73 = arith.constant 0 : index
      %c0_74 = arith.constant 0 : index
      %c0_75 = arith.constant 0 : index
      %209 = vector.load %arg2[%c0_73, %c0_74, %c0_75] : memref<2x8x32xf32, #tpu.memory_space<vmem>>, vector<2x8x32xf32>
      %c0_76 = arith.constant 0 : index
      %c0_77 = arith.constant 0 : index
      %c0_78 = arith.constant 0 : index
      %210 = vector.load %arg12[%c0_76, %c0_77, %c0_78] : memref<2x8x32xf32, #tpu.memory_space<vmem>>, vector<2x8x32xf32>
      tpu.vector_store %arg12[%c0_76, %c0_77, %c0_78], %209 {strides = array<i32>} : memref<2x8x32xf32, #tpu.memory_space<vmem>>, vector<2x8x32xf32>,
    } else {
    }
    %c0 = arith.constant 0 : index
    %c0_1 = arith.constant 0 : index
    %c0_2 = arith.constant 0 : index
    %3 = vector.load %arg10[%c0, %c0_1, %c0_2] : memref<1x16x32xf32, #tpu.memory_space<vmem>>, vector<1x16x32xf32>
    %4 = vector.shape_cast %3 : vector<1x16x32xf32> to vector<16x32xf32>
    %c0_3 = arith.constant 0 : index
    %c0_4 = arith.constant 0 : index
    %c0_5 = arith.constant 0 : index
    %5 = vector.load %arg11[%c0_3, %c0_4, %c0_5] : memref<1x1x64xf32, #tpu.memory_space<vmem>>, vector<1x1x64xf32>
    %6 = vector.shape_cast %5 : vector<1x1x64xf32> to vector<64xf32>
    %c0_6 = arith.constant 0 : index
    %c0_7 = arith.constant 0 : index
    %c0_8 = arith.constant 0 : index
    %7 = vector.load %arg12[%c0_6, %c0_7, %c0_8] : memref<2x8x32xf32, #tpu.memory_space<vmem>>, vector<2x8x32xf32>
    %8 = vector.shape_cast %7 : vector<2x8x32xf32> to vector<16x32xf32>
    %c0_9 = arith.constant 0 : index
    %c0_10 = arith.constant 0 : index
    %c0_11 = arith.constant 0 : index
    %9 = vector.load %arg3[%c0_9, %c0_10, %c0_11] : memref<2x8x32xf32, #tpu.memory_space<vmem>>, vector<2x8x32xf32>
    %10 = vector.shape_cast %9 : vector<2x8x32xf32> to vector<16x32xf32>
    %c0_12 = arith.constant 0 : index
    %c0_13 = arith.constant 0 : index
    %c0_14 = arith.constant 0 : index
    %11 = vector.load %arg4[%c0_12, %c0_13, %c0_14] : memref<2x8x1xf32, #tpu.memory_space<vmem>>, vector<2x8x1xf32>
    %12 = vector.extract_strided_slice %4 {offsets = [0, 0], sizes = [1, 32], strides = [1, 1]} : vector<16x32xf32> to vector<1x32xf32>
    %13 = vector.shape_cast %12 : vector<1x32xf32> to vector<32xf32>
    %14 = vector.extract_strided_slice %4 {offsets = [1, 0], sizes = [1, 32], strides = [1, 1]} : vector<16x32xf32> to vector<1x32xf32>
    %15 = vector.shape_cast %14 : vector<1x32xf32> to vector<32xf32>
    %cst = arith.constant dense<0.000000e+00> : vector<2x8xf32>
    %16 = vector.multi_reduction <add>, %7, %cst [2] : vector<2x8x32xf32> to vector<2x8xf32>
    %17 = vector.shape_cast %16 : vector<2x8xf32> to vector<2x8x1xf32>
    %cst_15 = arith.constant 3.200000e+01 : f32
    %18 = vector.broadcast %cst_15 : f32 to vector<2x8x1xf32>
    %19 = arith.divf %17, %18 : vector<2x8x1xf32>
    %20 = vector.broadcast %19 : vector<2x8x1xf32> to vector<2x8x32xf32>
    %21 = arith.subf %7, %20 : vector<2x8x32xf32>
    %22 = arith.mulf %21, %21 : vector<2x8x32xf32>
    %cst_16 = arith.constant dense<0.000000e+00> : vector<2x8xf32>
    %23 = vector.multi_reduction <add>, %22, %cst_16 [2] : vector<2x8x32xf32> to vector<2x8xf32>
    %24 = vector.shape_cast %23 : vector<2x8xf32> to vector<2x8x1xf32>
    %cst_17 = arith.constant 3.200000e+01 : f32
    %25 = vector.broadcast %cst_17 : f32 to vector<2x8x1xf32>
    %26 = arith.divf %24, %25 : vector<2x8x1xf32>
    %27 = vector.broadcast %19 : vector<2x8x1xf32> to vector<2x8x32xf32>
    %28 = arith.subf %7, %27 : vector<2x8x32xf32>
    %cst_18 = arith.constant 9.99999974E-6 : f32
    %29 = vector.broadcast %cst_18 : f32 to vector<2x8x1xf32>
    %30 = arith.addf %26, %29 : vector<2x8x1xf32>
    %31 = math.rsqrt %30 : vector<2x8x1xf32>
    %32 = vector.broadcast %31 : vector<2x8x1xf32> to vector<2x8x32xf32>
    %33 = arith.mulf %28, %32 : vector<2x8x32xf32>
    %34 = vector.shape_cast %13 : vector<32xf32> to vector<1x1x32xf32>
    %35 = vector.broadcast %34 : vector<1x1x32xf32> to vector<2x8x32xf32>
    %36 = arith.mulf %33, %35 : vector<2x8x32xf32>
    %37 = vector.shape_cast %15 : vector<32xf32> to vector<1x1x32xf32>
    %38 = vector.broadcast %37 : vector<1x1x32xf32> to vector<2x8x32xf32>
    %39 = arith.addf %36, %38 : vector<2x8x32xf32>
    %40 = vector.broadcast %11 : vector<2x8x1xf32> to vector<2x8x32xf32>
    %41 = arith.mulf %39, %40 : vector<2x8x32xf32>
    %42 = vector.shape_cast %41 : vector<2x8x32xf32> to vector<16x32xf32>
    %c0_19 = arith.constant 0 : index
    %c0_20 = arith.constant 0 : index
    %c0_21 = arith.constant 0 : index
    %43 = vector.load %arg5[%c0_19, %c0_20, %c0_21] : memref<1x32x32xf32, #tpu.memory_space<vmem>>, vector<1x32x32xf32>
    %44 = vector.shape_cast %43 : vector<1x32x32xf32> to vector<32x32xf32>
    %cst_22 = arith.constant dense<0.000000e+00> : vector<16x32xf32>
    %45 = tpu.matmul %42, %44, %cst_22 {dimension_numbers = #tpu.dot_dimension_numbers<[1], [0], [0], [1], [0, 0, 1, 1], [], []>} : vector<16x32xf32>, vector<32x32xf32>, vector<16x32xf32> -> vector<16x32xf32>
    %46 = vector.extract_strided_slice %4 {offsets = [2, 0], sizes = [1, 32], strides = [1, 1]} : vector<16x32xf32> to vector<1x32xf32>
    %47 = vector.shape_cast %46 : vector<1x32xf32> to vector<32xf32>
    %48 = vector.shape_cast %47 : vector<32xf32> to vector<1x32xf32>
    %49 = vector.broadcast %48 : vector<1x32xf32> to vector<16x32xf32>
    %50 = arith.addf %45, %49 : vector<16x32xf32>
    %c0_23 = arith.constant 0 : index
    %c0_24 = arith.constant 0 : index
    %c0_25 = arith.constant 0 : index
    %51 = vector.load %arg6[%c0_23, %c0_24, %c0_25] : memref<1x32x64xf32, #tpu.memory_space<vmem>>, vector<1x32x64xf32>
    %52 = vector.shape_cast %51 : vector<1x32x64xf32> to vector<32x64xf32>
    %cst_26 = arith.constant dense<0.000000e+00> : vector<16x64xf32>
    %53 = tpu.matmul %10, %52, %cst_26 {dimension_numbers = #tpu.dot_dimension_numbers<[1], [0], [0], [1], [0, 0, 1, 1], [], []>} : vector<16x32xf32>, vector<32x64xf32>, vector<16x64xf32> -> vector<16x64xf32>
    %54 = vector.extract_strided_slice %53 {offsets = [0, 0], sizes = [16, 32], strides = [1, 1]} : vector<16x64xf32> to vector<16x32xf32>
    %55 = vector.extract_strided_slice %4 {offsets = [3, 0], sizes = [1, 32], strides = [1, 1]} : vector<16x32xf32> to vector<1x32xf32>
    %56 = vector.shape_cast %55 : vector<1x32xf32> to vector<32xf32>
    %57 = vector.shape_cast %56 : vector<32xf32> to vector<1x32xf32>
    %58 = vector.broadcast %57 : vector<1x32xf32> to vector<16x32xf32>
    %59 = arith.addf %54, %58 : vector<16x32xf32>
    %60 = vector.extract_strided_slice %53 {offsets = [0, 32], sizes = [16, 32], strides = [1, 1]} : vector<16x64xf32> to vector<16x32xf32>
    %61 = vector.extract_strided_slice %4 {offsets = [4, 0], sizes = [1, 32], strides = [1, 1]} : vector<16x32xf32> to vector<1x32xf32>
    %62 = vector.shape_cast %61 : vector<1x32xf32> to vector<32xf32>
    %63 = vector.shape_cast %62 : vector<32xf32> to vector<1x32xf32>
    %64 = vector.broadcast %63 : vector<1x32xf32> to vector<16x32xf32>
    %65 = arith.addf %60, %64 : vector<16x32xf32>
    %66 = vector.extract_strided_slice %50 {offsets = [0, 0], sizes = [16, 8], strides = [1, 1]} : vector<16x32xf32> to vector<16x8xf32>
    %67 = vector.shape_cast %66 : vector<16x8xf32> to vector<2x8x8xf32>
    %68 = vector.extract_strided_slice %59 {offsets = [0, 0], sizes = [16, 8], strides = [1, 1]} : vector<16x32xf32> to vector<16x8xf32>
    %69 = vector.shape_cast %68 : vector<16x8xf32> to vector<2x8x8xf32>
    %70 = vector.extract_strided_slice %65 {offsets = [0, 0], sizes = [16, 8], strides = [1, 1]} : vector<16x32xf32> to vector<16x8xf32>
    %71 = vector.shape_cast %70 : vector<16x8xf32> to vector<2x8x8xf32>
    "tpu.trace_start"() <{level = 10 : i32, message = "bqd,bkd->bqk"}> : () -> ()
    %cst_27 = arith.constant dense<0.000000e+00> : vector<2x8x8xf32>
    %72 = tpu.matmul %67, %69, %cst_27 {dimension_numbers = #tpu.dot_dimension_numbers<[2], [2], [1], [1], [0, 0, 0, 1, 1, 1], [0], [0]>} : vector<2x8x8xf32>, vector<2x8x8xf32>, vector<2x8x8xf32> -> vector<2x8x8xf32>
    "tpu.trace_stop"() : () -> ()
    %cst_28 = arith.constant dense<0xFF800000> : vector<2x8xf32>
    %73 = vector.multi_reduction <maximumf>, %72, %cst_28 [2] : vector<2x8x8xf32> to vector<2x8xf32>
    %74 = vector.shape_cast %73 : vector<2x8xf32> to vector<2x8x1xf32>
    %75 = vector.broadcast %74 : vector<2x8x1xf32> to vector<2x8x8xf32>
    %76 = arith.subf %72, %75 : vector<2x8x8xf32>
    %77 = math.exp %76 : vector<2x8x8xf32>
    %cst_29 = arith.constant dense<0.000000e+00> : vector<2x8xf32>
    %78 = vector.multi_reduction <add>, %77, %cst_29 [2] : vector<2x8x8xf32> to vector<2x8xf32>
    %79 = vector.shape_cast %78 : vector<2x8xf32> to vector<2x8x1xf32>
    %80 = tpu.reciprocal %79 {approx = true} : vector<2x8x1xf32> -> vector<2x8x1xf32>
    %81 = vector.broadcast %80 : vector<2x8x1xf32> to vector<2x8x8xf32>
    %82 = arith.mulf %77, %81 : vector<2x8x8xf32>
    "tpu.trace_start"() <{level = 10 : i32, message = "bqk,bkd->bqd"}> : () -> ()
    %cst_30 = arith.constant dense<0.000000e+00> : vector<2x8x8xf32>
    %83 = tpu.matmul %82, %71, %cst_30 {dimension_numbers = #tpu.dot_dimension_numbers<[2], [1], [1], [2], [0, 0, 0, 1, 1, 2], [0], [0]>} : vector<2x8x8xf32>, vector<2x8x8xf32>, vector<2x8x8xf32> -> vector<2x8x8xf32>
    "tpu.trace_stop"() : () -> ()
    %84 = vector.shape_cast %83 : vector<2x8x8xf32> to vector<16x8xf32>
    %c0_31 = arith.constant 0 : index
    %c0_32 = arith.constant 0 : index
    %85 = vector.load %arg13[%c0_31, %c0_32] : memref<16x32xf32, #tpu.memory_space<vmem>>, vector<16x8xf32>
    tpu.vector_store %arg13[%c0_31, %c0_32], %84 {strides = array<i32>} : memref<16x32xf32, #tpu.memory_space<vmem>>, vector<16x8xf32>,
    %86 = vector.extract_strided_slice %50 {offsets = [0, 8], sizes = [16, 8], strides = [1, 1]} : vector<16x32xf32> to vector<16x8xf32>
    %87 = vector.shape_cast %86 : vector<16x8xf32> to vector<2x8x8xf32>
    %88 = vector.extract_strided_slice %59 {offsets = [0, 8], sizes = [16, 8], strides = [1, 1]} : vector<16x32xf32> to vector<16x8xf32>
    %89 = vector.shape_cast %88 : vector<16x8xf32> to vector<2x8x8xf32>
    %90 = vector.extract_strided_slice %65 {offsets = [0, 8], sizes = [16, 8], strides = [1, 1]} : vector<16x32xf32> to vector<16x8xf32>
    %91 = vector.shape_cast %90 : vector<16x8xf32> to vector<2x8x8xf32>
    "tpu.trace_start"() <{level = 10 : i32, message = "bqd,bkd->bqk"}> : () -> ()
    %cst_33 = arith.constant dense<0.000000e+00> : vector<2x8x8xf32>
    %92 = tpu.matmul %87, %89, %cst_33 {dimension_numbers = #tpu.dot_dimension_numbers<[2], [2], [1], [1], [0, 0, 0, 1, 1, 1], [0], [0]>} : vector<2x8x8xf32>, vector<2x8x8xf32>, vector<2x8x8xf32> -> vector<2x8x8xf32>
    "tpu.trace_stop"() : () -> ()
    %cst_34 = arith.constant dense<0xFF800000> : vector<2x8xf32>
    %93 = vector.multi_reduction <maximumf>, %92, %cst_34 [2] : vector<2x8x8xf32> to vector<2x8xf32>
    %94 = vector.shape_cast %93 : vector<2x8xf32> to vector<2x8x1xf32>
    %95 = vector.broadcast %94 : vector<2x8x1xf32> to vector<2x8x8xf32>
    %96 = arith.subf %92, %95 : vector<2x8x8xf32>
    %97 = math.exp %96 : vector<2x8x8xf32>
    %cst_35 = arith.constant dense<0.000000e+00> : vector<2x8xf32>
    %98 = vector.multi_reduction <add>, %97, %cst_35 [2] : vector<2x8x8xf32> to vector<2x8xf32>
    %99 = vector.shape_cast %98 : vector<2x8xf32> to vector<2x8x1xf32>
    %100 = tpu.reciprocal %99 {approx = true} : vector<2x8x1xf32> -> vector<2x8x1xf32>
    %101 = vector.broadcast %100 : vector<2x8x1xf32> to vector<2x8x8xf32>
    %102 = arith.mulf %97, %101 : vector<2x8x8xf32>
    "tpu.trace_start"() <{level = 10 : i32, message = "bqk,bkd->bqd"}> : () -> ()
    %cst_36 = arith.constant dense<0.000000e+00> : vector<2x8x8xf32>
    %103 = tpu.matmul %102, %91, %cst_36 {dimension_numbers = #tpu.dot_dimension_numbers<[2], [1], [1], [2], [0, 0, 0, 1, 1, 2], [0], [0]>} : vector<2x8x8xf32>, vector<2x8x8xf32>, vector<2x8x8xf32> -> vector<2x8x8xf32>
    "tpu.trace_stop"() : () -> ()
    %104 = vector.shape_cast %103 : vector<2x8x8xf32> to vector<16x8xf32>
    %c0_37 = arith.constant 0 : index
    %c8 = arith.constant 8 : index
    %105 = vector.load %arg13[%c0_37, %c8] : memref<16x32xf32, #tpu.memory_space<vmem>>, vector<16x8xf32>
    tpu.vector_store %arg13[%c0_37, %c8], %104 {strides = array<i32>} : memref<16x32xf32, #tpu.memory_space<vmem>>, vector<16x8xf32>,
    %106 = vector.extract_strided_slice %50 {offsets = [0, 16], sizes = [16, 8], strides = [1, 1]} : vector<16x32xf32> to vector<16x8xf32>
    %107 = vector.shape_cast %106 : vector<16x8xf32> to vector<2x8x8xf32>
    %108 = vector.extract_strided_slice %59 {offsets = [0, 16], sizes = [16, 8], strides = [1, 1]} : vector<16x32xf32> to vector<16x8xf32>
    %109 = vector.shape_cast %108 : vector<16x8xf32> to vector<2x8x8xf32>
    %110 = vector.extract_strided_slice %65 {offsets = [0, 16], sizes = [16, 8], strides = [1, 1]} : vector<16x32xf32> to vector<16x8xf32>
    %111 = vector.shape_cast %110 : vector<16x8xf32> to vector<2x8x8xf32>
    "tpu.trace_start"() <{level = 10 : i32, message = "bqd,bkd->bqk"}> : () -> ()
    %cst_38 = arith.constant dense<0.000000e+00> : vector<2x8x8xf32>
    %112 = tpu.matmul %107, %109, %cst_38 {dimension_numbers = #tpu.dot_dimension_numbers<[2], [2], [1], [1], [0, 0, 0, 1, 1, 1], [0], [0]>} : vector<2x8x8xf32>, vector<2x8x8xf32>, vector<2x8x8xf32> -> vector<2x8x8xf32>
    "tpu.trace_stop"() : () -> ()
    %cst_39 = arith.constant dense<0xFF800000> : vector<2x8xf32>
    %113 = vector.multi_reduction <maximumf>, %112, %cst_39 [2] : vector<2x8x8xf32> to vector<2x8xf32>
    %114 = vector.shape_cast %113 : vector<2x8xf32> to vector<2x8x1xf32>
    %115 = vector.broadcast %114 : vector<2x8x1xf32> to vector<2x8x8xf32>
    %116 = arith.subf %112, %115 : vector<2x8x8xf32>
    %117 = math.exp %116 : vector<2x8x8xf32>
    %cst_40 = arith.constant dense<0.000000e+00> : vector<2x8xf32>
    %118 = vector.multi_reduction <add>, %117, %cst_40 [2] : vector<2x8x8xf32> to vector<2x8xf32>
    %119 = vector.shape_cast %118 : vector<2x8xf32> to vector<2x8x1xf32>
    %120 = tpu.reciprocal %119 {approx = true} : vector<2x8x1xf32> -> vector<2x8x1xf32>
    %121 = vector.broadcast %120 : vector<2x8x1xf32> to vector<2x8x8xf32>
    %122 = arith.mulf %117, %121 : vector<2x8x8xf32>
    "tpu.trace_start"() <{level = 10 : i32, message = "bqk,bkd->bqd"}> : () -> ()
    %cst_41 = arith.constant dense<0.000000e+00> : vector<2x8x8xf32>
    %123 = tpu.matmul %122, %111, %cst_41 {dimension_numbers = #tpu.dot_dimension_numbers<[2], [1], [1], [2], [0, 0, 0, 1, 1, 2], [0], [0]>} : vector<2x8x8xf32>, vector<2x8x8xf32>, vector<2x8x8xf32> -> vector<2x8x8xf32>
    "tpu.trace_stop"() : () -> ()
    %124 = vector.shape_cast %123 : vector<2x8x8xf32> to vector<16x8xf32>
    %c0_42 = arith.constant 0 : index
    %c16 = arith.constant 16 : index
    %125 = vector.load %arg13[%c0_42, %c16] : memref<16x32xf32, #tpu.memory_space<vmem>>, vector<16x8xf32>
    tpu.vector_store %arg13[%c0_42, %c16], %124 {strides = array<i32>} : memref<16x32xf32, #tpu.memory_space<vmem>>, vector<16x8xf32>,
    %126 = vector.extract_strided_slice %50 {offsets = [0, 24], sizes = [16, 8], strides = [1, 1]} : vector<16x32xf32> to vector<16x8xf32>
    %127 = vector.shape_cast %126 : vector<16x8xf32> to vector<2x8x8xf32>
    %128 = vector.extract_strided_slice %59 {offsets = [0, 24], sizes = [16, 8], strides = [1, 1]} : vector<16x32xf32> to vector<16x8xf32>
    %129 = vector.shape_cast %128 : vector<16x8xf32> to vector<2x8x8xf32>
    %130 = vector.extract_strided_slice %65 {offsets = [0, 24], sizes = [16, 8], strides = [1, 1]} : vector<16x32xf32> to vector<16x8xf32>
    %131 = vector.shape_cast %130 : vector<16x8xf32> to vector<2x8x8xf32>
    "tpu.trace_start"() <{level = 10 : i32, message = "bqd,bkd->bqk"}> : () -> ()
    %cst_43 = arith.constant dense<0.000000e+00> : vector<2x8x8xf32>
    %132 = tpu.matmul %127, %129, %cst_43 {dimension_numbers = #tpu.dot_dimension_numbers<[2], [2], [1], [1], [0, 0, 0, 1, 1, 1], [0], [0]>} : vector<2x8x8xf32>, vector<2x8x8xf32>, vector<2x8x8xf32> -> vector<2x8x8xf32>
    "tpu.trace_stop"() : () -> ()
    %cst_44 = arith.constant dense<0xFF800000> : vector<2x8xf32>
    %133 = vector.multi_reduction <maximumf>, %132, %cst_44 [2] : vector<2x8x8xf32> to vector<2x8xf32>
    %134 = vector.shape_cast %133 : vector<2x8xf32> to vector<2x8x1xf32>
    %135 = vector.broadcast %134 : vector<2x8x1xf32> to vector<2x8x8xf32>
    %136 = arith.subf %132, %135 : vector<2x8x8xf32>
    %137 = math.exp %136 : vector<2x8x8xf32>
    %cst_45 = arith.constant dense<0.000000e+00> : vector<2x8xf32>
    %138 = vector.multi_reduction <add>, %137, %cst_45 [2] : vector<2x8x8xf32> to vector<2x8xf32>
    %139 = vector.shape_cast %138 : vector<2x8xf32> to vector<2x8x1xf32>
    %140 = tpu.reciprocal %139 {approx = true} : vector<2x8x1xf32> -> vector<2x8x1xf32>
    %141 = vector.broadcast %140 : vector<2x8x1xf32> to vector<2x8x8xf32>
    %142 = arith.mulf %137, %141 : vector<2x8x8xf32>
    "tpu.trace_start"() <{level = 10 : i32, message = "bqk,bkd->bqd"}> : () -> ()
    %cst_46 = arith.constant dense<0.000000e+00> : vector<2x8x8xf32>
    %143 = tpu.matmul %142, %131, %cst_46 {dimension_numbers = #tpu.dot_dimension_numbers<[2], [1], [1], [2], [0, 0, 0, 1, 1, 2], [0], [0]>} : vector<2x8x8xf32>, vector<2x8x8xf32>, vector<2x8x8xf32> -> vector<2x8x8xf32>
    "tpu.trace_stop"() : () -> ()
    %144 = vector.shape_cast %143 : vector<2x8x8xf32> to vector<16x8xf32>
    %c0_47 = arith.constant 0 : index
    %c24 = arith.constant 24 : index
    %145 = vector.load %arg13[%c0_47, %c24] : memref<16x32xf32, #tpu.memory_space<vmem>>, vector<16x8xf32>
    tpu.vector_store %arg13[%c0_47, %c24], %144 {strides = array<i32>} : memref<16x32xf32, #tpu.memory_space<vmem>>, vector<16x8xf32>,
    %c0_48 = arith.constant 0 : index
    %c0_49 = arith.constant 0 : index
    %146 = vector.load %arg13[%c0_48, %c0_49] : memref<16x32xf32, #tpu.memory_space<vmem>>, vector<16x32xf32>
    %c0_50 = arith.constant 0 : index
    %c0_51 = arith.constant 0 : index
    %c0_52 = arith.constant 0 : index
    %147 = vector.load %arg7[%c0_50, %c0_51, %c0_52] : memref<1x32x32xf32, #tpu.memory_space<vmem>>, vector<1x32x32xf32>
    %148 = vector.shape_cast %147 : vector<1x32x32xf32> to vector<32x32xf32>
    %cst_53 = arith.constant dense<0.000000e+00> : vector<16x32xf32>
    %149 = tpu.matmul %146, %148, %cst_53 {dimension_numbers = #tpu.dot_dimension_numbers<[1], [0], [0], [1], [0, 0, 1, 1], [], []>} : vector<16x32xf32>, vector<32x32xf32>, vector<16x32xf32> -> vector<16x32xf32>
    %150 = vector.extract_strided_slice %4 {offsets = [5, 0], sizes = [1, 32], strides = [1, 1]} : vector<16x32xf32> to vector<1x32xf32>
    %151 = vector.shape_cast %150 : vector<1x32xf32> to vector<32xf32>
    %152 = vector.shape_cast %151 : vector<32xf32> to vector<1x32xf32>
    %153 = vector.broadcast %152 : vector<1x32xf32> to vector<16x32xf32>
    %154 = arith.addf %149, %153 : vector<16x32xf32>
    %155 = arith.addf %8, %154 : vector<16x32xf32>
    %156 = vector.extract_strided_slice %4 {offsets = [6, 0], sizes = [1, 32], strides = [1, 1]} : vector<16x32xf32> to vector<1x32xf32>
    %157 = vector.shape_cast %156 : vector<1x32xf32> to vector<32xf32>
    %158 = vector.extract_strided_slice %4 {offsets = [7, 0], sizes = [1, 32], strides = [1, 1]} : vector<16x32xf32> to vector<1x32xf32>
    %159 = vector.shape_cast %158 : vector<1x32xf32> to vector<32xf32>
    %cst_54 = arith.constant dense<0.000000e+00> : vector<16xf32>
    %160 = vector.multi_reduction <add>, %155, %cst_54 [1] : vector<16x32xf32> to vector<16xf32>
    %161 = vector.shape_cast %160 : vector<16xf32> to vector<16x1xf32>
    %cst_55 = arith.constant 3.200000e+01 : f32
    %162 = vector.broadcast %cst_55 : f32 to vector<16x1xf32>
    %163 = arith.divf %161, %162 : vector<16x1xf32>
    %164 = vector.broadcast %163 : vector<16x1xf32> to vector<16x32xf32>
    %165 = arith.subf %155, %164 : vector<16x32xf32>
    %166 = arith.mulf %165, %165 : vector<16x32xf32>
    %cst_56 = arith.constant dense<0.000000e+00> : vector<16xf32>
    %167 = vector.multi_reduction <add>, %166, %cst_56 [1] : vector<16x32xf32> to vector<16xf32>
    %168 = vector.shape_cast %167 : vector<16xf32> to vector<16x1xf32>
    %cst_57 = arith.constant 3.200000e+01 : f32
    %169 = vector.broadcast %cst_57 : f32 to vector<16x1xf32>
    %170 = arith.divf %168, %169 : vector<16x1xf32>
    %171 = vector.broadcast %163 : vector<16x1xf32> to vector<16x32xf32>
    %172 = arith.subf %155, %171 : vector<16x32xf32>
    %cst_58 = arith.constant 9.99999974E-6 : f32
    %173 = vector.broadcast %cst_58 : f32 to vector<16x1xf32>
    %174 = arith.addf %170, %173 : vector<16x1xf32>
    %175 = math.rsqrt %174 : vector<16x1xf32>
    %176 = vector.broadcast %175 : vector<16x1xf32> to vector<16x32xf32>
    %177 = arith.mulf %172, %176 : vector<16x32xf32>
    %178 = vector.shape_cast %157 : vector<32xf32> to vector<1x32xf32>
    %179 = vector.broadcast %178 : vector<1x32xf32> to vector<16x32xf32>
    %180 = arith.mulf %177, %179 : vector<16x32xf32>
    %181 = vector.shape_cast %159 : vector<32xf32> to vector<1x32xf32>
    %182 = vector.broadcast %181 : vector<1x32xf32> to vector<16x32xf32>
    %183 = arith.addf %180, %182 : vector<16x32xf32>
    %c0_59 = arith.constant 0 : index
    %c0_60 = arith.constant 0 : index
    %c0_61 = arith.constant 0 : index
    %184 = vector.load %arg8[%c0_59, %c0_60, %c0_61] : memref<1x32x64xf32, #tpu.memory_space<vmem>>, vector<1x32x64xf32>
    %185 = vector.shape_cast %184 : vector<1x32x64xf32> to vector<32x64xf32>
    %cst_62 = arith.constant dense<0.000000e+00> : vector<16x64xf32>
    %186 = tpu.matmul %183, %185, %cst_62 {dimension_numbers = #tpu.dot_dimension_numbers<[1], [0], [0], [1], [0, 0, 1, 1], [], []>} : vector<16x32xf32>, vector<32x64xf32>, vector<16x64xf32> -> vector<16x64xf32>
    %187 = vector.shape_cast %6 : vector<64xf32> to vector<1x64xf32>
    %188 = vector.broadcast %187 : vector<1x64xf32> to vector<16x64xf32>
    %189 = arith.addf %186, %188 : vector<16x64xf32>
    %cst_63 = arith.constant 5.000000e-01 : f32
    %190 = vector.broadcast %cst_63 : f32 to vector<16x64xf32>
    %191 = arith.mulf %190, %189 : vector<16x64xf32>
    %cst_64 = arith.constant 0.707106769 : f32
    %192 = vector.broadcast %cst_64 : f32 to vector<16x64xf32>
    %193 = arith.mulf %189, %192 : vector<16x64xf32>
    %194 = math.erf %193 : vector<16x64xf32>
    %cst_65 = arith.constant 1.000000e+00 : f32
    %195 = vector.broadcast %cst_65 : f32 to vector<16x64xf32>
    %196 = arith.addf %195, %194 : vector<16x64xf32>
    %197 = arith.mulf %191, %196 : vector<16x64xf32>
    %c0_66 = arith.constant 0 : index
    %c0_67 = arith.constant 0 : index
    %c0_68 = arith.constant 0 : index
    %198 = vector.load %arg9[%c0_66, %c0_67, %c0_68] : memref<1x64x32xf32, #tpu.memory_space<vmem>>, vector<1x64x32xf32>
    %199 = vector.shape_cast %198 : vector<1x64x32xf32> to vector<64x32xf32>
    %cst_69 = arith.constant dense<0.000000e+00> : vector<16x32xf32>
    %200 = tpu.matmul %197, %199, %cst_69 {dimension_numbers = #tpu.dot_dimension_numbers<[1], [0], [0], [1], [0, 0, 1, 1], [], []>} : vector<16x64xf32>, vector<64x32xf32>, vector<16x32xf32> -> vector<16x32xf32>
    %201 = arith.addf %155, %200 : vector<16x32xf32>
    %202 = vector.extract_strided_slice %4 {offsets = [8, 0], sizes = [1, 32], strides = [1, 1]} : vector<16x32xf32> to vector<1x32xf32>
    %203 = vector.shape_cast %202 : vector<1x32xf32> to vector<32xf32>
    %204 = vector.shape_cast %203 : vector<32xf32> to vector<1x32xf32>
    %205 = vector.broadcast %204 : vector<1x32xf32> to vector<16x32xf32>
    %206 = arith.addf %201, %205 : vector<16x32xf32>
    %207 = vector.shape_cast %206 : vector<16x32xf32> to vector<2x8x32xf32>
    %c0_70 = arith.constant 0 : index
    %c0_71 = arith.constant 0 : index
    %c0_72 = arith.constant 0 : index
    %208 = vector.load %arg12[%c0_70, %c0_71, %c0_72] : memref<2x8x32xf32, #tpu.memory_space<vmem>>, vector<2x8x32xf32>
    tpu.vector_store %arg12[%c0_70, %c0_71, %c0_72], %207 {strides = array<i32>} : memref<2x8x32xf32, #tpu.memory_space<vmem>>, vector<2x8x32xf32>,
    return
  }
  func.func @transform_0(%arg0: i32, %arg1: i32) -> (i32, i32, i32) {
    %c0_i32 = arith.constant 0 : i32
    %c0_i32_0 = arith.constant 0 : i32
    %c0_i32_1 = arith.constant 0 : i32
    return %arg0, %c0_i32, %c0_i32_0 : i32, i32, i32
  }
  func.func @transform_1(%arg0: i32, %arg1: i32) -> (i32, i32, i32) {
    %c0_i32 = arith.constant 0 : i32
    %c0_i32_0 = arith.constant 0 : i32
    %c0_i32_1 = arith.constant 0 : i32
    return %arg0, %c0_i32, %c0_i32_0 : i32, i32, i32
  }
  func.func @transform_2(%arg0: i32, %arg1: i32) -> (i32, i32, i32) {
    %c0_i32 = arith.constant 0 : i32
    %c0_i32_0 = arith.constant 0 : i32
    %c0_i32_1 = arith.constant 0 : i32
    return %arg0, %c0_i32, %c0_i32_0 : i32, i32, i32
  }
  func.func @transform_3(%arg0: i32, %arg1: i32) -> (i32, i32, i32) {
    %c0_i32 = arith.constant 0 : i32
    %c0_i32_0 = arith.constant 0 : i32
    %c0_i32_1 = arith.constant 0 : i32
    return %arg1, %c0_i32, %c0_i32_0 : i32, i32, i32
  }
  func.func @transform_4(%arg0: i32, %arg1: i32) -> (i32, i32, i32) {
    %c0_i32 = arith.constant 0 : i32
    %c0_i32_0 = arith.constant 0 : i32
    %c0_i32_1 = arith.constant 0 : i32
    return %arg1, %c0_i32, %c0_i32_0 : i32, i32, i32
  }
  func.func @transform_5(%arg0: i32, %arg1: i32) -> (i32, i32, i32) {
    %c0_i32 = arith.constant 0 : i32
    %c0_i32_0 = arith.constant 0 : i32
    %c0_i32_1 = arith.constant 0 : i32
    return %arg1, %c0_i32, %c0_i32_0 : i32, i32, i32
  }
  func.func @transform_6(%arg0: i32, %arg1: i32) -> (i32, i32, i32) {
    %c0_i32 = arith.constant 0 : i32
    %c0_i32_0 = arith.constant 0 : i32
    %c0_i32_1 = arith.constant 0 : i32
    return %arg1, %c0_i32, %c0_i32_0 : i32, i32, i32
  }
  func.func @transform_7(%arg0: i32, %arg1: i32) -> (i32, i32, i32) {
    %c0_i32 = arith.constant 0 : i32
    %c0_i32_0 = arith.constant 0 : i32
    %c0_i32_1 = arith.constant 0 : i32
    return %arg1, %c0_i32, %c0_i32_0 : i32, i32, i32
  }
  func.func @transform_8(%arg0: i32, %arg1: i32) -> (i32, i32, i32) {
    %c0_i32 = arith.constant 0 : i32
    %c0_i32_0 = arith.constant 0 : i32
    %c0_i32_1 = arith.constant 0 : i32
    return %arg1, %c0_i32, %c0_i32_0 : i32, i32, i32
  }
  func.func @transform_9(%arg0: i32, %arg1: i32) -> (i32, i32, i32) {
    %c0_i32 = arith.constant 0 : i32
    %c0_i32_0 = arith.constant 0 : i32
    %c0_i32_1 = arith.constant 0 : i32
    return %arg1, %c0_i32, %c0_i32_0 : i32, i32, i32
  }
  func.func @transform_10(%arg0: i32, %arg1: i32) -> (i32, i32, i32) {
    %c0_i32 = arith.constant 0 : i32
    %c0_i32_0 = arith.constant 0 : i32
    %c0_i32_1 = arith.constant 0 : i32
    return %arg0, %c0_i32, %c0_i32_0 : i32, i32, i32
  }
}

</mosaic_0001>

<bundles_post_ra>
// kernel: tpu_custom_call.1
= control target key start
LH: loop header
LB: loop body
LE: loop exit
PB: predicated region body
PF: predicated region fallthrough
CT: control target
= control target key end

     0   :  { %s3904_s0 = inlined_call_operand.hbm [shape: f32[2,8,32], index: 0, kind: input, shape index: {}]   ;;  %s3905_s1 = inlined_call_operand.hbm [shape: f32[2,8,32], index: 1, kind: input, shape index: {}]   ;;  %s3906_s2 = inlined_call_operand.vmem [shape: f32[2,8,1], index: 2, kind: input, shape index: {}]   ;;  %s3907_s3 = inlined_call_operand.vmem [shape: f32[2,32,32], index: 3, kind: input, shape index: {}]   ;;  %s3908_s4 = inlined_call_operand.vmem [shape: f32[2,32,64], index: 4, kind: input, shape index: {}]   ;;  %s3909_s5 = inlined_call_operand.vmem [shape: f32[2,32,32], index: 5, kind: input, shape index: {}]   ;;  %s3910_s6 = inlined_call_operand.hbm [shape: f32[2,32,64], index: 6, kind: input, shape index: {}]   ;;  %s3911_s7 = inlined_call_operand.vmem [shape: f32[2,64,32], index: 7, kind: input, shape index: {}]   ;;  %s3912_s8 = inlined_call_operand.vmem [shape: f32[2,16,32], index: 8, kind: input, shape index: {}]   ;;  %s3913_s9 = inlined_call_operand.vmem [shape: f32[2,1,64], index: 9, kind: input, shape index: {}]   ;;  %s3914_s10 = inlined_call_operand.hbm [shape: f32[2,8,32], index: 10, kind: output, shape index: {}]  }
   0x1   :  { %3923 = sst [smem:[#allocation15_spill]] %s3904_s0 }
   0x2   :  { %3924 = sst [smem:[#allocation16_spill]] %s3905_s1 }
   0x3   :  { %3925 = sst [smem:[#allocation17_spill]] %s3906_s2 }
   0x4   :  { %3926 = sst [smem:[#allocation18_spill]] %s3907_s3 }
   0x5   :  { %3927 = sst [smem:[#allocation19_spill]] %s3910_s6 }
   0x6   :  { %3928 = sst [smem:[#allocation20_spill]] %s3912_s8 }
   0x7   :  { %3929 = sst [smem:[#allocation21_spill]] %s3913_s9 }
   0x8   :  { %3930 = sst [smem:[#allocation22_spill]] %s3914_s10 }
   0x9   :  { %15 = vsyncpa [#allocation4], 0 }
   0xa   :  { %16 = vsyncpa [#allocation7], 0 }
   0xb   :  { %17 = vsyncpa [#allocation5], 0  ;;  %s3415_s13 = smov 0   ;;  %s3417_s14 = smov 0  }
   0xc   :  { %s3419_s15 = smov 0   ;;  %s3421_s16 = smov 0  }
   0xd   :  { %s3423_s17 = smov 0   ;;  %s3425_s18 = smov 0  }
   0xe LB: > { %s3444_s19 = sadd.s32 4294967295, %s3337_s18   ;;  %p205_p0 = scmp.ne.s32.totalorder %s3325_s15, %s3321_s14  ;;  %s3337_s18 = sphi %s3425_s18, %s23_s18   ;;  %s3333_s17 = sphi %s3423_s17, %s3959_s17   ;;  %s3329_s16 = sphi %s3421_s16, %s3958_s16   ;;  %s3325_s15 = sphi %s3419_s15, %s3957_s15   ;;  %s3321_s14 = sphi %s3417_s14, %s3956_s14   ;;  %s3317_s13 = sphi %s3415_s13, %s3955_s13  }
   0xf   : > { %p206_p1 = scmp.eq.s32.totalorder %s3337_s18, 0  ;;  %p211_p2 = scmp.ne.s32.totalorder %s3321_s14, %s3317_s13 }
  0x10   : > { %p3915_p3 = scmp.eq.s32.totalorder %s3444_s19, 0  ;;  %p2692_p4 = scmp.ge.s32.totalorder %s3337_s18, 1 }
  0x11   : > { %p207_p5 = por %p206_p1, %p205_p0  ;;  %p326_p6 = scmp.lt.s32.totalorder %s3337_s18, 3 }
  0x12   : > { %p3455_p7 = por %p3915_p3, %p211_p2  ;;  %s3339_s22 = smov [#allocation3]  }
  0x13   : > { %p3459_p8 = pnand %p2692_p4, %p326_p6  ;;  %s341_s23 = sshll.u32 %s3339_s22, 4  ;;  %s342_s23 = int_to_ptr.vmem [resolvable:$true] %s341_s23 }
  0x14   : > { %s3931_s20 = scalar_select %p3455_p7, 1, 0 }
  0x15   : > { %s3932_s21 = scalar_select %p3459_p8, 1, 0 }
  0x16   : > { %p3031_p9 = pneg %p3459_p8  ;;  %p3044_p11 = scmp.lt.s32.totalorder %s3337_s18, 2 }
  0x17   : > { %s3935_s0 = sld [smem:[#allocation15_spill]] }
  0x18   : > { %p3467_p10 = pnand %p3031_p9, %p3915_p3  ;;  %p3472_p12 = pnand %p3044_p11, %p207_p5 }
  0x1a   : > { %s3934_s25 = scalar_select %p3472_p12, 1, 0 }
  0x1b   : > { %p3165_p0 = pneg %p3467_p10 }
  0x1d   : > { %s3163_s28 = scalar_lea.hbm %s3935_s0, 256 }
  0x1e   : > { %p3164_p13 = scmp.ne.s32.totalorder %s3935_s0, %s3163_s28  ;;  %p3170_p4 = scmp.lt.u32.totalorder %s3163_s28, %s3935_s0 }
  0x20   : > { %p3166_p1 = pnand %p3165_p0, %p3164_p13 }
  0x22   : > { %p3167_p2 = pneg %p3166_p1 }
  0x24   : > { %p3172_p5 = pnand %p3170_p4, %p3167_p2 }
  0x26   : > { %3175 = shalt.err (!%p3172_p5)
}
  0x27   : > { %s3176_s13 = scalar_lea.vmem %s342_s23, 256  ;;  %p3184_p3 = scmp.lt.s32.totalorder %s342_s23, %s342_s23 }
  0x28   : > { %p3177_p6 = scmp.ne.s32.totalorder %s342_s23, %s3176_s13  ;;  %p3185_p7 = scmp.lt.s32.totalorder %s3176_s13, %s3176_s13 }
  0x2a   : > { %p3179_p9 = pnand %p3177_p6, %p3165_p0  ;;  %p3186_p8 = por %p3185_p7, %p3184_p3 }
  0x2c   : > { %p3180_p11 = pneg %p3179_p9 }
  0x2e   : > { %p3187_p12 = pnand %p3186_p8, %p3180_p11 }
  0x30   : > { %3190 = shalt.err (!%p3187_p12)
}
  0x31   : > { %s3921_s22 = smov 128   ;;  %s3341_s26 = smov 8  }
  0x32   : > { %3034 = dma.hbm_to_vmem [thread:$0]  (!%p3467_p10), %s3935_s0, 256, %s342_s23, [#allocation4], %s3921_s22, %s3921_s22, %s3341_s26  }
  0x33   : > { %s3342_s29 = smov [#allocation6]   ;;  %s3936_s1 = sld [smem:[#allocation16_spill]] }
  0x34   : > { %s357_s30 = sshll.u32 %s3342_s29, 4  ;;  %s358_s30 = int_to_ptr.vmem [resolvable:$true] %s357_s30 }
  0x39   : > { %s3191_s13 = scalar_lea.hbm %s3936_s1, 256 }
  0x3a   : > { %p3192_p3 = scmp.ne.s32.totalorder %s3936_s1, %s3191_s13  ;;  %p3198_p12 = scmp.lt.u32.totalorder %s3191_s13, %s3936_s1 }
  0x3c   : > { %p3194_p7 = pnand %p3192_p3, %p3165_p0 }
  0x3e   : > { %p3195_p8 = pneg %p3194_p7 }
  0x40   : > { %p3200_p13 = pnand %p3198_p12, %p3195_p8 }
  0x42   : > { %3203 = shalt.err (!%p3200_p13)
}
  0x43   : > { %s3204_s23 = scalar_lea.vmem %s358_s30, 256  ;;  %p3212_p5 = scmp.lt.s32.totalorder %s358_s30, %s358_s30 }
  0x44   : > { %p3205_p1 = scmp.ne.s32.totalorder %s358_s30, %s3204_s23  ;;  %p3213_p6 = scmp.lt.s32.totalorder %s3204_s23, %s3204_s23 }
  0x46   : > { %p3207_p2 = pnand %p3205_p1, %p3165_p0  ;;  %p3214_p9 = por %p3213_p6, %p3212_p5 }
  0x48   : > { %p3208_p4 = pneg %p3207_p2 }
  0x4a   : > { %p3215_p11 = pnand %p3214_p9, %p3208_p4 }
  0x4c   : > { %3218 = shalt.err (!%p3215_p11)
}
  0x4d   : > { %3037 = dma.hbm_to_vmem [thread:$0]  (!%p3467_p10), %s3936_s1, 256, %s358_s30, [#allocation7], %s3921_s22, %s3921_s22, %s3341_s26  }
  0x4e   : > { %s32_s9 = sadd.s32 1, %s3333_s17  ;;  %s198_s10 = sadd.s32 1, %s3325_s15 }
  0x4f   : > { %p33_p0 = scmp.ge.s32.totalorder %s32_s9, 2  ;;  %s404_s27 = sand.u32 1, %s3337_s18  }
  0x50   : > { %s406_s24 = sand.u32 1, %s3325_s15   ;;  %s2754_s29 = sshll.u32 %s3333_s17, 9 }
  0x51   : > { %s3961_s9 = smov (%p33_p0, %s32_s9), 0  ;;  %s2697_s28 = sshll.u32 %s406_s24, 5 }
  0x52   : > { %3937 = sst [smem:[#allocation14_spill]] %s3961_s9  ;;  %s195_s11 = ssub.s32 %s3333_s17, %s3961_s9 }
  0x53   : > { %p196_p3 = scmp.eq.s32.totalorder %s195_s11, 0  ;;  %s3938_s6 = sld [smem:[#allocation19_spill]] }
  0x54   : > { %s408_s30 = scalar_lea.vmem [#allocation8], %s2697_s28  ;;  %s3543_s22 = scalar_lea.sflag [#allocation4], %s404_s27 }
  0x55   : > { %s415_s2 = sshll.u32 %s408_s30, 4  ;;  %p3939_p7 = scmp.ne.s32.totalorder %s3934_s25, 0  ;;  %s3541_s2 = int_to_ptr.vmem [resolvable:$true] %s415_s2 }
  0x56   : > { %s3539_s8 = scalar_select %p196_p3, %s3325_s15, %s198_s10  }
  0x57   : > { %p3221_p8 = pneg %p3939_p7 }
  0x59   : > { %s3536_s23 = scalar_lea.hbm %s3938_s6, %s2754_s29  ;;  %s3224_s12 = scalar_lea.hbm %s3938_s6, 1024 }
  0x5a   : > { %s3219_s24 = scalar_lea.hbm %s3536_s23, 512  ;;  %p3225_p1 = scmp.lt.u32.totalorder %s3536_s23, %s3938_s6 }
  0x5b   : > { %p3220_p10 = scmp.ne.s32.totalorder %s3536_s23, %s3219_s24  ;;  %p3226_p2 = scmp.lt.u32.totalorder %s3224_s12, %s3219_s24 }
  0x5c   : > { %p3228_p5 = scmp.lt.u32.totalorder %s3219_s24, %s3536_s23 }
  0x5d   : > { %p3222_p12 = pnand %p3221_p8, %p3220_p10  ;;  %p3227_p4 = por %p3226_p2, %p3225_p1 }
  0x5f   : > { %p3223_p13 = pneg %p3222_p12  ;;  %p3229_p6 = por %p3228_p5, %p3227_p4 }
  0x61   : > { %p3230_p9 = pnand %p3229_p6, %p3223_p13 }
  0x63   : > { %3233 = shalt.err (!%p3230_p9)
}
  0x64   : > { %s3234_s10 = scalar_lea.vmem %s3541_s2, 512  ;;  %s3343_s27 = smov [#allocation8]  }
  0x65   : > { %p3235_p11 = scmp.ne.s32.totalorder %s3541_s2, %s3234_s10  ;;  %s3239_s30 = sshll.u32 %s3343_s27, 4  ;;  %s3240_s30 = int_to_ptr.vmem [resolvable:$false] %s3239_s30 }
  0x66   : > { %s3241_s29 = scalar_lea.vmem %s3240_s30, 1024  ;;  %p3242_p10 = scmp.lt.s32.totalorder %s3541_s2, %s3240_s30 }
  0x67   : > { %p3237_p0 = pnand %p3235_p11, %p3221_p8  ;;  %p3243_p12 = scmp.lt.s32.totalorder %s3241_s29, %s3234_s10 }
  0x69   : > { %p3238_p3 = pneg %p3237_p0  ;;  %p3244_p1 = por %p3243_p12, %p3242_p10 }
  0x6b   : > { %p3245_p2 = pnand %p3244_p1, %p3238_p3 }
  0x6d   : > { %3248 = shalt.err (!%p3245_p2)
}
  0x6e   : > { %s3940_s24 = smov 128   ;;  %p3941_p8 = scmp.ne.s32.totalorder %s3932_s21, 0 }
  0x6f   : > { %3041 = dma.hbm_to_vmem [thread:$0]  (!%p3939_p7), %s3536_s23, 512, %s3541_s2, %s3543_s22, %s3940_s24, %s3940_s24, %s3341_s26  }
  0x70   : > { %449 = sbr.rel (%p3941_p8) target bundleno = 4178 (0x1052), region = 60  ;;  %p3942_p13 = scmp.eq.s32.totalorder (!%p3941_p8), %s3444_s19, 0 }
  0x77   : > { %3300 = dma.done.wait (%p3942_p13), [#allocation4], 256   ;;  %p3943_p4 = pmov %p3942_p13 }
  0x79   : > { %3302 = vsyncadd (%p3943_p4), [#allocation4], 4294967040  ;;  %p3944_p5 = pmov %p3943_p4 }
  0x7a   : > { %p3945_p6 = pmov %p3943_p4 }
  0x7b   : > { %3304 = dma.done.wait (%p3944_p5), [#allocation7], 256  }
  0x7c   : > { %3306 = vsyncadd (%p3945_p6), [#allocation7], 4294967040  ;;  %s459_s25 = sand.u32 1, %s3444_s19   ;;  %s461_s22 = sand.u32 1, %s3321_s14  }
  0x7d   : > { %s2703_s26 = sshll.u32 %s461_s22, 5  ;;  %s460_s21 = scalar_lea.sflag [#allocation4], %s459_s25 }
  0x7e   : > { %s3586_s23 = scalar_lea.vmem [#allocation8], %s2703_s26  ;;  %p3946_p7 = scmp.ne.s32.totalorder %s3931_s20, 0 }
  0x80   : > { %3308 = dma.done.wait (%p3946_p7), %s460_s21, 512  }
  0x81   : > { %3310 = vsyncadd (%p3946_p7), %s460_s21, 4294966784  ;;  %p536_p9 = scmp.lt.s32.totalorder %s3329_s16, 1  ;;  %s3947_s3 = sld [smem:[#allocation18_spill]] }
  0x82   : > { %s3948_s13 = sld [smem:[#allocation21_spill]]  ;;  %s3949_s27 = sld [smem:[#allocation20_spill]] }
  0x83   : > { %s3594_s2 = scalar_select %p536_p9, %s3329_s16, 1 }
  0x84   : > { %p2714_p11 = scmp.ne.s32.totalorder %s3329_s16, 0 }
  0x85   : > { %s2755_s11 = sshll.u32 %s3594_s2, 5  ;;  %s2758_s12 = sshll.u32 %s3594_s2, 6  ;;  %v569_v0 = vld [vmem:[#allocation3] sm:$0xff] (!%p2714_p11)  ;;  %vm571_vm0 = vcmask (!%p2714_p11), 261120   ;;  %v570_v1 = vld [vmem:[#allocation3 + $0x8] sm:$0xff] (!%p2714_p11) }
  0x86   : > { %s3606_s20 = scalar_lea.vmem %s3908_s4, %s2755_s11  ;;  %s3611_s25 = scalar_lea.vmem %s3909_s5, %s2755_s11  ;;  %572 = vst.msk [vmem:[#allocation9] sm:$0xff] (!%p2714_p11), %vm571_vm0, %v569_v0  ;;  %573 = vst.msk [vmem:[#allocation9 + $0x8] sm:$0xff] (!%p2714_p11), %vm571_vm0, %v570_v1 }
  0x87   : > { %s3601_s10 = scalar_lea.vmem %s3947_s3, %s2755_s11  ;;  %s3616_s21 = scalar_lea.vmem %s3911_s7, %s2758_s12 }
  0x88   : > { %s2759_s0 = sshll.u32 %s3594_s2, 4  ;;  %s563_s3 = scalar_lea.vmem %s3948_s13, %s3594_s2 }
  0x89   : > { %s3626_s30 = scalar_lea.vmem %s3949_s27, %s2759_s0  ;;  %568 = sbr.rel (%p2714_p11) target bundleno = 144 (0x90), region = 76 }
  0x90 PF: > { %v3629_v2 = vld [vmem:[#allocation9] sm:$0xff]  ;;  %vm583_vm1 = vcmask 261120   ;;  %v3631_v3 = vld [vmem:[#allocation9 + $0x8] sm:$0xff]  ;;  %s3950_s6 = sld [smem:[#allocation17_spill]]  ;;  %v3344_v7 = vmov 0   ;;  %v635_v19 = vld [vmem:[%s3601_s10] sm:$0xff]  ;;  %v611_v30 = vlaneseq }
  0x91   : > { %v584_v4 = vsel %vm583_vm1, %v3629_v2, 0.0  ;;  %v587_v5 = vsel %vm583_vm1, %v3631_v3, 0.0  ;;  %3117 = vset.pattern.permute.xlu0 %v3344_v7  ;;  %3118 = vset.pattern.permute.xlu1 %v3344_v7  ;;  %v636_v20 = vld [vmem:[%s3601_s10 + $0x8] sm:$0xff]  ;;  %v637_v22 = vld [vmem:[%s3601_s10 + $0x10] sm:$0xff]  ;;  %v638_v23 = vld [vmem:[%s3601_s10 + $0x18] sm:$0xff]  ;;  %v3345_v58 = vmov 0.0  }
  0x92   : > { %585 = vadd.xlane.f32.xlu0 %v584_v4  ;;  %v2969_v21 = vpack.c.bf16 %v636_v20, %v635_v19  ;;  %v2973_v24 = vpack.c.bf16 %v638_v23, %v637_v22  ;;  %v724_v25 = vld [vmem:[%s3606_s20] sm:$0xff]  ;;  %v725_v26 = vld [vmem:[%s3606_s20 + $0x8] sm:$0xff]  ;;  %v3653_v34 = vshrl.u32 %v611_v30, 7  ;;  %v726_v51 = vld [vmem:[%s3606_s20 + $0x10] sm:$0xff]  ;;  %2848 = vmatprep.subr.mxu0 %v3345_v58  ;;  %vm3346_vm2 = vmmov 0   ;;  %s3347_s11 = smov 32  }
  0x93   : > { %v2977_v27 = vpack.c.bf16 %v725_v26, %v724_v25  ;;  %v3657_v37 = vld [vmem:[%s3626_s30] sm:$0xff]  ;;  %v727_v52 = vld [vmem:[%s3606_s20 + $0x18] sm:$0xff]  ;;  %v580_v57 = vld [vmem:[#allocation6 + $0x8] sm:$0xff]  ;;  %2850 = vmatprep.mubr.msk.f32.mxu0 %vm3346_vm2, %v3345_v58  ;;  %vm825_vm3 = vcmask 64512   ;;  %s3348_s12 = smov 96   ;;  %s3349_s10 = smov 120  }
  0x94   : > { %2970 = vmatprep.subr.bf16.mxu1 %v2969_v21  ;;  %v613_v36 = vsub.s32 0, %v3653_v34  ;;  %v619_v38 = vsub.s32 1, %v3653_v34  ;;  %v2981_v55 = vpack.c.bf16 %v727_v52, %v726_v51  ;;  %v579_v56 = vld [vmem:[#allocation6] sm:$0xff]  ;;  %v811_v61 = vsub.s32 3, %v3653_v34  ;;  %s3350_s20 = smov 88   ;;  %s3351_s29 = smov 112  }
  0x95   : > { %2972 = vmatpush3.bf16.msra.mxu1 %v2969_v21  ;;  %v641_v62 = vsub.s32 2, %v3653_v34  ;;  %s3352_s24 = smov 80   ;;  %s3353_s22 = smov 104   ;;  %vm1494_vm4 = vcmask 130112   ;;  %vm1835_vm5 = vcmask 195712   ;;  %vm2176_vm6 = vcmask 261312  }
  0x96   : > { %588 = vadd.xlane.f32.xlu0 %v587_v5  ;;  %v581_v6 = vld [vmem:[%s3950_s6] sm:$0xff]  ;;  %v582_v18 = vld [vmem:[%s3950_s6 + $0x8] sm:$0xff]  ;;  %2974 = vmatprep.subr.bf16.mxu1 %v2973_v24  ;;  %v614_v39 = vrot.slane %v3657_v37, %v613_v36  ;;  %v620_v42 = vrot.slane %v3657_v37, %v619_v38  ;;  %v812_v63 = vrot.slane %v3657_v37, %v811_v61  ;;  %s3354_s26 = smov 72   ;;  %s3355_s28 = smov 8   ;;  %vm2419_vm7 = vcmask 523264  }
  0x97   : > { %v642_v0 = vrot.slane %v3657_v37, %v641_v62  ;;  %s3356_s13 = smov 16   ;;  %s3357_s27 = smov 24  }
  0x98   : > { %p3047_p0 = scmp.eq.s32.totalorder %s3444_s19, 1 }
  0x99   : > { %2976 = vmatpush3.bf16.msra.mxu1 %v2973_v24 }
  0x9a   : > { %2978 = vmatprep.subr.bf16.mxu1 %v2977_v27 }
  0xac   : > { %625 = vperm.xlu0 %3117, %v581_v6  }
 0x11f   : > { %v586_v8 = vpop.xlane.xlu0 %585 }
 0x120   : > { %v591_v9 = vmul.f32 0.03125, %v586_v8 }
 0x122   : > { %v593_v10 = vsub.f32 %v3629_v2, %v591_v9 }
 0x123   : > { %v589_v11 = vpop.xlane.xlu0 %588 }
 0x124   : > { %v592_v12 = vmul.f32 0.03125, %v589_v11  ;;  %v595_v13 = vmul.f32 %v593_v10, %v593_v10 }
 0x126   : > { %v594_v14 = vsub.f32 %v3631_v3, %v592_v12  ;;  %v597_v15 = vsel %vm583_vm1, %v595_v13, 0.0 }
 0x127   : > { %598 = vadd.xlane.f32.xlu1 %v597_v15  ;;  %v817_v15 = vsub.s32 4, %v3653_v34 }
 0x128   : > { %v596_v16 = vmul.f32 %v594_v14, %v594_v14 }
 0x12a   : > { %v600_v17 = vsel %vm583_vm1, %v596_v16, 0.0  ;;  %v818_v16 = vrot.slane %v3657_v37, %v817_v15 }
 0x12b   : > { %601 = vadd.xlane.f32.xlu1 %v600_v17  ;;  %v626_v45 = vpop.permute.xlu0 %625 }
 0x13c   : > { %630 = vperm.xlu1 %3118, %v582_v18  }
 0x1b4   : > { %v599_v28 = vpop.xlane.xlu1 %598 }
 0x1b5   : > { %v603_v29 = vmul.f32 0.03125, %v599_v28 }
 0x1b7   : > { %v605_v31 = vadd.f32 1e-05, %v603_v29 }
 0x1b8   : > { %v602_v32 = vpop.xlane.xlu1 %601 }
 0x1b9   : > { %3119 = vrsqrt.f32 %v605_v31  ;;  %v604_v33 = vmul.f32 0.03125, %v602_v32 }
 0x1bb   : > { %v606_v35 = vadd.f32 1e-05, %v604_v33 }
 0x1bc   : > { %v631_v50 = vpop.permute.xlu1 %630 }
 0x1bd   : > { %3121 = vrsqrt.f32 %v606_v35 }
 0x1c3   : > { %v3120_v40 = vpop.eup %3119 }
 0x1c4   : > { %v609_v41 = vmul.f32 %v3120_v40, %v593_v10 }
 0x1c6   : > { %v615_v43 = vmul.f32 %v614_v39, %v609_v41 }
 0x1c7   : > { %v3122_v44 = vpop.eup %3121 }
 0x1c8   : > { %v621_v46 = vadd.f32 %v620_v42, %v615_v43  ;;  %v610_v47 = vmul.f32 %v3122_v44, %v594_v14 }
 0x1ca   : > { %v633_v48 = vmul.f32 %v626_v45, %v621_v46  ;;  %v616_v49 = vmul.f32 %v614_v39, %v610_v47 }
 0x1cc   : > { %2834 = vmatprep.mubr.msk.f32.mxu1 %vm583_vm1, %v633_v48  ;;  %v622_v53 = vadd.f32 %v620_v42, %v616_v49 }
 0x1ce   : > { %v634_v54 = vmul.f32 %v631_v50, %v622_v53 }
 0x1d0   : > { %2835 = vmatmul.mubr.msk.f32.vlgmr.msra.gmra.mrb[0].mxu1 %vm583_vm1, %v634_v54 }
 0x1d1   : > { %2980 = vmatpush3.bf16.msra.mxu1 %v2977_v27  ;;  %2845 = vmatprep.mubr.msk.f32.mxu1 %vm583_vm1, %v579_v56 }
 0x1d2   : > { %2982 = vmatprep.subr.bf16.mxu1 %v2981_v55 }
 0x1d5   : > { %2984 = vmatpush3.bf16.msra.mxu1 %v2981_v55 }
 0x1d6   : > { %2853 = vmatprep.subr.mxu1 %v3345_v58 }
 0x1d8   : > { %2846 = vmatmul.mubr.msk.f32.vlgmr.msra.gmra.mrb[2].mxu1 %vm583_vm1, %v580_v57 }
 0x1d9   : > { %2855 = vmatprep.mubr.msk.f32.mxu1 %vm3346_vm2, %v3345_v58 }
 0x2a3   : > { %v2836_v59 = vpop.f32.mrb[0].mxu1 }
 0x2a4   : > { %v715_v60 = vpop.f32.mrb[1].mxu1  ;;  %v3686_v7 = vadd.f32 %v2836_v59, %v642_v0 }
 0x2a5   : > { %v3691_v8 = vadd.f32 %v715_v60, %v642_v0 }
 0x2ab   : > { %v2847_v1 = vpop.f32.mrb[2].mxu1 }
 0x2ac   : > { %v3680_v4 = vadd.f32 %v2847_v1, %v812_v63  ;;  %v800_v5 = vpop.f32.mrb[3].mxu1 }
 0x2ad   : > { %v3682_v6 = vadd.f32 %v812_v63, %v800_v5 }
 0x2ae   : > { %2854 = vmatpush3.xpose.msk.msra.mxu1 %vm825_vm3, %v3680_v4 }
 0x2af   : > { %2849 = vmatpush3.xpose.msk.msra.mxu0 %vm825_vm3, %v3682_v6  ;;  %2863 = vmatprep.subr.mxu1 %v3345_v58 }
 0x2b0   : > { %2858 = vmatprep.subr.mxu0 %v3345_v58 }
 0x2b1   : > { %2856 = vmatmul.mubr.msk.f32.vlgmr.msra.gmra.mrb[4].mxu1 %vm825_vm3, %v3686_v7 }
 0x2b2   : > { %2851 = vmatmul.mubr.msk.f32.vlgmr.msra.gmra.mrb[0].mxu0 %vm825_vm3, %v3691_v8  ;;  %2865 = vmatprep.mubr.msk.f32.mxu1 %vm3346_vm2, %v3345_v58 }
 0x2b3   : > { %2860 = vmatprep.mubr.msk.f32.mxu0 %vm3346_vm2, %v3345_v58 }
 0x384   : > { %v974_v9 = vpop.f32.mrb[4].mxu1 }
 0x385   : > { %v898_v10 = vpop.f32.mrb[0].mxu0  ;;  %v2857_v11 = vpop.f32.mrb[5].mxu1  ;;  %v981_v12 = vsel %vm825_vm3, %v974_v9, -inf }
 0x386   : > { %982 = vmax.xlane.f32.xlu0 %v981_v12  ;;  %v2852_v13 = vpop.f32.mrb[1].mxu0  ;;  %v978_v14 = vsel %vm825_vm3, %v898_v10, -inf }
 0x387   : > { %979 = vmax.xlane.f32.xlu1 %v978_v14 }
 0x398   : > { %820 = vrot.lane.b32.xlu1 %v818_v16, %s3347_s11 }
 0x413   : > { %v983_v25 = vpop.xlane.xlu0 %982 }
 0x414   : > { %v980_v17 = vpop.xlane.xlu1 %979  ;;  %v985_v26 = vsub.f32 %v974_v9, %v983_v25 }
 0x415   : > { %v984_v18 = vsub.f32 %v898_v10, %v980_v17 }
 0x416   : > { %v988_v27 = vmul.f32 1.442695, %v985_v26 }
 0x417   : > { %v986_v19 = vmul.f32 1.442695, %v984_v18 }
 0x418   : > { %v821_v20 = vpop.permute.xlu1 %820 }
 0x419   : > { %3123 = vpow2.f32 %v986_v19  ;;  %v3706_v21 = vadd.f32 %v821_v20, %v800_v5  ;;  %v3709_v22 = vadd.f32 %v2847_v1, %v821_v20 }
 0x41a   : > { %3125 = vpow2.f32 %v988_v27 }
 0x41b   : > { %1001 = vrot.lane.b32.xlu0 %v3706_v21, %s3348_s12 }
 0x41f   : > { %1078 = vrot.lane.b32.xlu0 %v3709_v22, %s3348_s12 }
 0x423   : > { %v3124_v23 = vpop.eup %3123  ;;  %1158 = vrot.lane.b32.xlu0 %v3682_v6, %s3349_s10 }
 0x424   : > { %v990_v24 = vsel %vm825_vm3, %v3124_v23, 0.0  ;;  %v3126_v28 = vpop.eup %3125 }
 0x425   : > { %991 = vadd.xlane.f32.xlu1 %v990_v24  ;;  %v993_v29 = vsel %vm825_vm3, %v3126_v28, 0.0 }
 0x436   : > { %1236 = vrot.lane.b32.xlu1 %v3680_v4, %s3349_s10 }
 0x442   : > { %994 = vadd.xlane.f32.xlu0 %v993_v29 }
 0x458   : > { %1156 = vrot.lane.b32.xlu0 %v3691_v8, %s3349_s10 }
 0x45c   : > { %1234 = vrot.lane.b32.xlu0 %v3686_v7, %s3349_s10 }
 0x48d   : > { %v1002_v30 = vpop.permute.xlu0 %1001 }
 0x48e   : > { %2859 = vmatpush3.msra.mxu0 %v1002_v30 }
 0x48f   : > { %2868 = vmatprep.subr.mxu0 %v3345_v58 }
 0x491   : > { %v1079_v31 = vpop.permute.xlu0 %1078 }
 0x492   : > { %2864 = vmatpush3.msra.mxu1 %v1079_v31 }
 0x493   : > { %2873 = vmatprep.subr.mxu1 %v3345_v58 }
 0x495   : > { %v1159_v38 = vpop.permute.xlu0 %1158 }
 0x4b2   : > { %v992_v32 = vpop.xlane.xlu1 %991 }
 0x4b3   : > { %3127 = vrcp.f32 %v992_v32 }
 0x4b6   : > { %v1237_v43 = vpop.permute.xlu1 %1236 }
 0x4bd   : > { %v3128_v33 = vpop.eup %3127 }
 0x4be   : > { %v998_v35 = vmul.f32 %v3128_v33, %v3124_v23 }
 0x4c0   : > { %2861 = vmatmul.mubr.msk.f32.vlgmr.msra.gmra.mrb[2].mxu0 %vm825_vm3, %v998_v35 }
 0x4c1   : > { %2869 = vmatpush3.xpose.msk.msra.mxu0 %vm825_vm3, %v1159_v38  ;;  %2870 = vmatprep.mubr.msk.f32.mxu0 %vm3346_vm2, %v3345_v58 }
 0x4c2   : > { %2878 = vmatprep.subr.mxu0 %v3345_v58 }
 0x4cf   : > { %v995_v39 = vpop.xlane.xlu0 %994 }
 0x4d0   : > { %3129 = vrcp.f32 %v995_v39 }
 0x4d3   : > { %v1157_v40 = vpop.permute.xlu0 %1156 }
 0x4d4   : > { %2871 = vmatmul.mubr.msk.f32.vlgmr.msra.gmra.mrb[4].mxu0 %vm825_vm3, %v1157_v40 }
 0x4d5   : > { %2880 = vmatprep.mubr.msk.f32.mxu0 %vm3346_vm2, %v3345_v58 }
 0x4d7   : > { %v1235_v44 = vpop.permute.xlu0 %1234 }
 0x4da   : > { %v3130_v41 = vpop.eup %3129 }
 0x4db   : > { %v999_v42 = vmul.f32 %v3130_v41, %v3126_v28 }
 0x4dd   : > { %2866 = vmatmul.mubr.msk.f32.vlgmr.msra.gmra.mrb[6].mxu1 %vm825_vm3, %v999_v42 }
 0x4de   : > { %2874 = vmatpush3.xpose.msk.msra.mxu1 %vm825_vm3, %v1237_v43  ;;  %2875 = vmatprep.mubr.msk.f32.mxu1 %vm3346_vm2, %v3345_v58 }
 0x4df   : > { %2883 = vmatprep.subr.mxu1 %v3345_v58 }
 0x4e1   : > { %2876 = vmatmul.mubr.msk.f32.vlgmr.msra.gmra.mrb[8].mxu1 %vm825_vm3, %v1235_v44 }
 0x4e2   : > { %2885 = vmatprep.mubr.msk.f32.mxu1 %vm3346_vm2, %v3345_v58 }
 0x593   : > { %v1073_v45 = vpop.f32.mrb[2].mxu0 }
 0x594   : > { %1154 = vst.msk [vmem:[#allocation2] sm:$0xff] %vm825_vm3, %v1073_v45  ;;  %v2862_v46 = vpop.f32.mrb[3].mxu0 }
 0x5a7   : > { %v1230_v47 = vpop.f32.mrb[4].mxu0 }
 0x5a8   : > { %v2872_v48 = vpop.f32.mrb[5].mxu0  ;;  %v1312_v49 = vsel %vm825_vm3, %v1230_v47, -inf }
 0x5a9   : > { %1313 = vmax.xlane.f32.xlu0 %v1312_v49 }
 0x5b0   : > { %v1150_v50 = vpop.f32.mrb[6].mxu1 }
 0x5b1   : > { %1155 = vst.msk [vmem:[#allocation2 + $0x8] sm:$0xff] %vm825_vm3, %v1150_v50  ;;  %v2867_v51 = vpop.f32.mrb[7].mxu1 }
 0x5b4   : > { %v1308_v52 = vpop.f32.mrb[8].mxu1 }
 0x5b5   : > { %v2877_v53 = vpop.f32.mrb[9].mxu1  ;;  %v1315_v54 = vsel %vm825_vm3, %v1308_v52, -inf }
 0x5b6   : > { %1316 = vmax.xlane.f32.xlu1 %v1315_v54 }
 0x5bf   : > { %1334 = vrot.lane.b32.xlu0 %v3706_v21, %s3350_s20 }
 0x5c7   : > { %1410 = vrot.lane.b32.xlu1 %v3709_v22, %s3350_s20 }
 0x5cb   : > { %1499 = vrot.lane.b32.xlu1 %v3682_v6, %s3351_s29 }
 0x5cf   : > { %1497 = vrot.lane.b32.xlu1 %v3691_v8, %s3351_s29 }
 0x636   : > { %v1314_v55 = vpop.xlane.xlu0 %1313 }
 0x637   : > { %v1318_v57 = vsub.f32 %v1230_v47, %v1314_v55 }
 0x639   : > { %v1320_v61 = vmul.f32 1.442695, %v1318_v57 }
 0x63a   : > { %v1335_v56 = vpop.permute.xlu0 %1334 }
 0x63b   : > { %2879 = vmatpush3.msra.mxu0 %v1335_v56 }
 0x63c   : > { %2888 = vmatprep.subr.mxu0 %v3345_v58 }
 0x643   : > { %v1317_v59 = vpop.xlane.xlu1 %1316 }
 0x644   : > { %v1319_v60 = vsub.f32 %v1308_v52, %v1317_v59 }
 0x646   : > { %v1322_v62 = vmul.f32 1.442695, %v1319_v60 }
 0x647   : > { %v1411_v63 = vpop.permute.xlu1 %1410 }
 0x648   : > { %3131 = vpow2.f32 %v1322_v62  ;;  %2884 = vmatpush3.msra.mxu1 %v1411_v63 }
 0x649   : > { %2893 = vmatprep.subr.mxu1 %v3345_v58  ;;  %3133 = vpow2.f32 %v1320_v61 }
 0x64b   : > { %v1500_v16 = vpop.permute.xlu1 %1499 }
 0x64f   : > { %v1498_v19 = vpop.permute.xlu1 %1497 }
 0x652   : > { %v3132_v0 = vpop.eup %3131 }
 0x653   : > { %v1327_v1 = vsel %vm825_vm3, %v3132_v0, 0.0  ;;  %v3134_v5 = vpop.eup %3133 }
 0x654   : > { %1328 = vadd.xlane.f32.xlu0 %v1327_v1  ;;  %v1324_v9 = vsel %vm825_vm3, %v3134_v5, 0.0 }
 0x658   : > { %1325 = vadd.xlane.f32.xlu0 %v1324_v9 }
 0x66e   : > { %1577 = vrot.lane.b32.xlu0 %v3680_v4, %s3351_s29 }
 0x672   : > { %1575 = vrot.lane.b32.xlu0 %v3686_v7, %s3351_s29 }
 0x6e1   : > { %v1329_v10 = vpop.xlane.xlu0 %1328 }
 0x6e2   : > { %3135 = vrcp.f32 %v1329_v10 }
 0x6e5   : > { %v1326_v11 = vpop.xlane.xlu0 %1325 }
 0x6e6   : > { %3137 = vrcp.f32 %v1326_v11 }
 0x6e9   : > { %v1578_v13 = vpop.permute.xlu0 %1577 }
 0x6ec   : > { %v3136_v12 = vpop.eup %3135 }
 0x6ed   : > { %v1333_v14 = vmul.f32 %v3136_v12, %v3132_v0  ;;  %v1576_v18 = vpop.permute.xlu0 %1575 }
 0x6ef   : > { %2886 = vmatmul.mubr.msk.f32.vlgmr.msra.gmra.mrb[10].mxu1 %vm825_vm3, %v1333_v14 }
 0x6f0   : > { %v3138_v15 = vpop.eup %3137  ;;  %2894 = vmatpush3.xpose.msk.msra.mxu1 %vm825_vm3, %v1578_v13  ;;  %2895 = vmatprep.mubr.msk.f32.mxu1 %vm3346_vm2, %v3345_v58 }
 0x6f1   : > { %v1332_v17 = vmul.f32 %v3138_v15, %v3134_v5  ;;  %2903 = vmatprep.subr.mxu1 %v3345_v58 }
 0x6f3   : > { %2881 = vmatmul.mubr.msk.f32.vlgmr.msra.gmra.mrb[6].mxu0 %vm825_vm3, %v1332_v17  ;;  %2896 = vmatmul.mubr.msk.f32.vlgmr.msra.gmra.mrb[12].mxu1 %vm825_vm3, %v1576_v18 }
 0x6f4   : > { %2889 = vmatpush3.xpose.msk.msra.mxu0 %vm825_vm3, %v1500_v16  ;;  %2890 = vmatprep.mubr.msk.f32.mxu0 %vm3346_vm2, %v3345_v58 }
 0x6f5   : > { %2898 = vmatprep.subr.mxu0 %v3345_v58  ;;  %2905 = vmatprep.mubr.msk.f32.mxu1 %vm3346_vm2, %v3345_v58 }
 0x6f7   : > { %2891 = vmatmul.mubr.msk.f32.vlgmr.msra.gmra.mrb[8].mxu0 %vm825_vm3, %v1498_v19 }
 0x6f8   : > { %2900 = vmatprep.mubr.msk.f32.mxu0 %vm3346_vm2, %v3345_v58 }
 0x7c2   : > { %v3766_v20 = vpop.f32.mrb[10].mxu1 }
 0x7c3   : > { %v2887_v23 = vpop.f32.mrb[11].mxu1 }
 0x7c6   : > { %v3768_v24 = vpop.f32.mrb[6].mxu0  ;;  %v1649_v25 = vpop.f32.mrb[12].mxu1 }
 0x7c7   : > { %v2882_v26 = vpop.f32.mrb[7].mxu0  ;;  %v2897_v27 = vpop.f32.mrb[13].mxu1  ;;  %v1656_v28 = vsel %vm825_vm3, %v1649_v25, -inf }
 0x7c8   : > { %1657 = vmax.xlane.f32.xlu0 %v1656_v28  ;;  %v2181_v27 = vld [vmem:[%s3611_s25] sm:$0xff]  ;;  %v2182_v28 = vld [vmem:[%s3611_s25 + $0x8] sm:$0xff] }
 0x7ca   : > { %v1571_v29 = vpop.f32.mrb[8].mxu0 }
 0x7cb   : > { %v2892_v30 = vpop.f32.mrb[9].mxu0  ;;  %v1653_v31 = vsel %vm825_vm3, %v1571_v29, -inf }
 0x7cc   : > { %1654 = vmax.xlane.f32.xlu1 %v1653_v31  ;;  %v2183_v30 = vld [vmem:[%s3611_s25 + $0x10] sm:$0xff]  ;;  %v2184_v31 = vld [vmem:[%s3611_s25 + $0x18] sm:$0xff] }
 0x7dd   : > { %1751 = vrot.lane.b32.xlu1 %v3709_v22, %s3352_s24 }
 0x7de   : > { %1675 = vrot.lane.b32.xlu0 %v3706_v21, %s3352_s24 }
 0x7e1   : > { %1840 = vrot.lane.b32.xlu1 %v3682_v6, %s3353_s22 }
 0x855   : > { %v1658_v32 = vpop.xlane.xlu0 %1657 }
 0x856   : > { %v1660_v33 = vsub.f32 %v1649_v25, %v1658_v32  ;;  %v2989_v32 = vpack.c.bf16 %v2184_v31, %v2183_v30  ;;  %v2416_v30 = vld [vmem:[%s3616_s21 + $0x28] sm:$0xff] }
 0x858   : > { %v1663_v35 = vmul.f32 1.442695, %v1660_v33 }
 0x859   : > { %v1676_v38 = vpop.permute.xlu0 %1675  ;;  %v1655_v39 = vpop.xlane.xlu1 %1654 }
 0x85a   : > { %3139 = vpow2.f32 %v1663_v35  ;;  %v1659_v40 = vsub.f32 %v1571_v29, %v1655_v39  ;;  %2899 = vmatpush3.msra.mxu0 %v1676_v38  ;;  %v2985_v29 = vpack.c.bf16 %v2182_v28, %v2181_v27  ;;  %v2413_v27 = vld [vmem:[%s3616_s21 + $0x10] sm:$0xff] }
 0x85b   : > { %2908 = vmatprep.subr.mxu0 %v3345_v58 }
 0x85c   : > { %v1661_v41 = vmul.f32 1.442695, %v1659_v40 }
 0x85d   : > { %v1752_v42 = vpop.permute.xlu1 %1751 }
 0x85e   : > { %3141 = vpow2.f32 %v1661_v41  ;;  %2904 = vmatpush3.msra.mxu1 %v1752_v42 }
 0x85f   : > { %2913 = vmatprep.subr.mxu1 %v3345_v58 }
 0x861   : > { %v1841_v46 = vpop.permute.xlu1 %1840 }
 0x864   : > { %v3140_v43 = vpop.eup %3139 }
 0x865   : > { %v1668_v44 = vsel %vm825_vm3, %v3140_v43, 0.0 }
 0x866   : > { %1669 = vadd.xlane.f32.xlu1 %v1668_v44  ;;  %v2187_v44 = vsub.s32 5, %v3653_v34 }
 0x868   : > { %v3142_v6 = vpop.eup %3141 }
 0x869   : > { %v1665_v45 = vsel %vm825_vm3, %v3142_v6, 0.0 }
 0x86a   : > { %1666 = vadd.xlane.f32.xlu0 %v1665_v45 }
 0x877   : > { %1838 = vrot.lane.b32.xlu1 %v3691_v8, %s3353_s22 }
 0x880   : > { %1918 = vrot.lane.b32.xlu0 %v3680_v4, %s3353_s22 }
 0x884   : > { %1916 = vrot.lane.b32.xlu0 %v3686_v7, %s3353_s22 }
 0x8f3   : > { %v1670_v47 = vpop.xlane.xlu1 %1669 }
 0x8f4   : > { %3143 = vrcp.f32 %v1670_v47 }
 0x8f7   : > { %v1667_v48 = vpop.xlane.xlu0 %1666  ;;  %v1839_v7 = vpop.permute.xlu1 %1838 }
 0x8f8   : > { %3145 = vrcp.f32 %v1667_v48 }
 0x8fb   : > { %v1919_v50 = vpop.permute.xlu0 %1918 }
 0x8fe   : > { %v3144_v49 = vpop.eup %3143 }
 0x8ff   : > { %v1674_v51 = vmul.f32 %v3144_v49, %v3140_v43  ;;  %v1917_v4 = vpop.permute.xlu0 %1916 }
 0x901   : > { %2906 = vmatmul.mubr.msk.f32.vlgmr.msra.gmra.mrb[14].mxu1 %vm825_vm3, %v1674_v51 }
 0x902   : > { %v3146_v52 = vpop.eup %3145  ;;  %2914 = vmatpush3.xpose.msk.msra.mxu1 %vm825_vm3, %v1919_v50  ;;  %2915 = vmatprep.mubr.msk.f32.mxu1 %vm3346_vm2, %v3345_v58 }
 0x903   : > { %v1673_v8 = vmul.f32 %v3146_v52, %v3142_v6  ;;  %2923 = vmatprep.subr.mxu1 %v3345_v58  ;;  %v2188_v6 = vrot.slane %v3657_v37, %v2187_v44 }
 0x905   : > { %2901 = vmatmul.mubr.msk.f32.vlgmr.msra.gmra.mrb[10].mxu0 %vm825_vm3, %v1673_v8  ;;  %2916 = vmatmul.mubr.msk.f32.vlgmr.msra.gmra.mrb[16].mxu1 %vm825_vm3, %v1917_v4 }
 0x906   : > { %2909 = vmatpush3.xpose.msk.msra.mxu0 %vm825_vm3, %v1841_v46  ;;  %2910 = vmatprep.mubr.msk.f32.mxu0 %vm3346_vm2, %v3345_v58 }
 0x907   : > { %2918 = vmatprep.subr.mxu0 %v3345_v58  ;;  %2925 = vmatprep.mubr.msk.f32.mxu1 %vm3346_vm2, %v3345_v58 }
 0x909   : > { %2911 = vmatmul.mubr.msk.f32.vlgmr.msra.gmra.mrb[12].mxu0 %vm825_vm3, %v1839_v7 }
 0x90a   : > { %2920 = vmatprep.mubr.msk.f32.mxu0 %vm3346_vm2, %v3345_v58 }
 0x9d4   : > { %v1823_v53 = vpop.f32.mrb[14].mxu1 }
 0x9d5   : > { %v2907_v54 = vpop.f32.mrb[15].mxu1 }
 0x9d8   : > { %v1747_v55 = vpop.f32.mrb[10].mxu0  ;;  %v1990_v56 = vpop.f32.mrb[16].mxu1 }
 0x9d9   : > { %v2902_v57 = vpop.f32.mrb[11].mxu0  ;;  %v2917_v59 = vpop.f32.mrb[17].mxu1  ;;  %v1997_v60 = vsel %vm825_vm3, %v1990_v56, -inf }
 0x9da   : > { %1998 = vmax.xlane.f32.xlu0 %v1997_v60  ;;  %v2310_v59 = vld [vmem:[%s3586_s23] sm:$0xff]  ;;  %v2311_v60 = vld [vmem:[%s3586_s23 + $0x8] sm:$0xff] }
 0x9dc   : > { %v1912_v61 = vpop.f32.mrb[12].mxu0 }
 0x9dd   : > { %v2912_v62 = vpop.f32.mrb[13].mxu0  ;;  %v1994_v63 = vsel %vm825_vm3, %v1912_v61, -inf }
 0x9de   : > { %1995 = vmax.xlane.f32.xlu1 %v1994_v63  ;;  %v2312_v62 = vld [vmem:[%s3586_s23 + $0x10] sm:$0xff]  ;;  %v2313_v63 = vld [vmem:[%s3586_s23 + $0x18] sm:$0xff] }
 0xa67   : > { %v1999_v0 = vpop.xlane.xlu0 %1998 }
 0xa68   : > { %v2001_v1 = vsub.f32 %v1990_v56, %v1999_v0  ;;  %v2997_v0 = vpack.c.bf16 %v2313_v63, %v2312_v62 }
 0xa6a   : > { %v2004_v5 = vmul.f32 1.442695, %v2001_v1 }
 0xa6b   : > { %v1996_v9 = vpop.xlane.xlu1 %1995 }
 0xa6c   : > { %3147 = vpow2.f32 %v2004_v5  ;;  %v2000_v58 = vsub.f32 %v1912_v61, %v1996_v9  ;;  %v2993_v61 = vpack.c.bf16 %v2311_v60, %v2310_v59 }
 0xa6e   : > { %v2002_v10 = vmul.f32 1.442695, %v2000_v58 }
 0xa70   : > { %3149 = vpow2.f32 %v2002_v10 }
 0xa76   : > { %v3148_v11 = vpop.eup %3147 }
 0xa77   : > { %v2009_v12 = vsel %vm825_vm3, %v3148_v11, 0.0 }
 0xa78   : > { %2010 = vadd.xlane.f32.xlu1 %v2009_v12  ;;  %v2300_v12 = vsub.s32 6, %v3653_v34 }
 0xa7a   : > { %v3150_v13 = vpop.eup %3149 }
 0xa7b   : > { %v2006_v14 = vsel %vm825_vm3, %v3150_v13, 0.0 }
 0xa7c   : > { %2007 = vadd.xlane.f32.xlu0 %v2006_v14  ;;  %v2301_v14 = vrot.slane %v3657_v37, %v2300_v12 }
 0xa89   : > { %2092 = vrot.lane.b32.xlu1 %v3709_v22, %s3354_s26 }
 0xa8d   : > { %1488 = vrot.lane.b32.xlu1 %v3768_v24, %s3355_s28 }
 0xa91   : > { %1829 = vrot.lane.b32.xlu1 %v1747_v55, %s3356_s13 }
 0xa92   : > { %2016 = vrot.lane.b32.xlu0 %v3706_v21, %s3354_s26 }
 0xa96   : > { %1490 = vrot.lane.b32.xlu0 %v3766_v20, %s3355_s28 }
 0xa9a   : > { %1831 = vrot.lane.b32.xlu0 %v1823_v53, %s3356_s13 }
 0xb05   : > { %v2011_v15 = vpop.xlane.xlu1 %2010 }
 0xb06   : > { %3151 = vrcp.f32 %v2011_v15 }
 0xb09   : > { %v2008_v16 = vpop.xlane.xlu0 %2007  ;;  %v2093_v17 = vpop.permute.xlu1 %2092 }
 0xb0a   : > { %3153 = vrcp.f32 %v2008_v16  ;;  %2924 = vmatpush3.msra.mxu1 %v2093_v17 }
 0xb0b   : > { %2994 = vmatprep.subr.bf16.mxu1 %v2993_v61 }
 0xb0d   : > { %v2017_v22 = vpop.permute.xlu0 %2016  ;;  %v1489_v18 = vpop.permute.xlu1 %1488 }
 0xb0e   : > { %1495 = vst.msk [vmem:[#allocation2] sm:$0xff] %vm1494_vm4, %v1489_v18  ;;  %2919 = vmatpush3.msra.mxu0 %v2017_v22 }
 0xb0f   : > { %2986 = vmatprep.subr.bf16.mxu0 %v2985_v29 }
 0xb10   : > { %v3152_v21 = vpop.eup %3151 }
 0xb11   : > { %v2015_v19 = vmul.f32 %v3152_v21, %v3148_v11  ;;  %v1491_v20 = vpop.permute.xlu0 %1490  ;;  %v1830_v23 = vpop.permute.xlu1 %1829 }
 0xb12   : > { %1496 = vst.msk [vmem:[#allocation2 + $0x8] sm:$0xff] %vm1494_vm4, %v1491_v20 }
 0xb13   : > { %1836 = vst.msk [vmem:[#allocation2] sm:$0xff] %vm1835_vm5, %v1830_v23  ;;  %2926 = vmatmul.mubr.msk.f32.vlgmr.msra.gmra.mrb[18].mxu1 %vm825_vm3, %v2015_v19 }
 0xb14   : > { %v3154_v24 = vpop.eup %3153  ;;  %2996 = vmatpush3.bf16.msra.mxu1 %v2993_v61 }
 0xb15   : > { %v2014_v25 = vmul.f32 %v3154_v24, %v3150_v13  ;;  %v1832_v26 = vpop.permute.xlu0 %1831  ;;  %2998 = vmatprep.subr.bf16.mxu1 %v2997_v0  ;;  %v2306_v13 = vsub.s32 7, %v3653_v34  ;;  %v2411_v24 = vld [vmem:[%s3616_s21] sm:$0xff] }
 0xb16   : > { %1837 = vst.msk [vmem:[#allocation2 + $0x8] sm:$0xff] %vm1835_vm5, %v1832_v26 }
 0xb17   : > { %2921 = vmatmul.mubr.msk.f32.vlgmr.msra.gmra.mrb[14].mxu0 %vm825_vm3, %v2014_v25  ;;  %v2307_v18 = vrot.slane %v3657_v37, %v2306_v13  ;;  %v2412_v25 = vld [vmem:[%s3616_s21 + $0x8] sm:$0xff]  ;;  %v2414_v37 = vld [vmem:[%s3616_s21 + $0x18] sm:$0xff] }
 0xb18   : > { %2988 = vmatpush3.bf16.msra.mxu0 %v2985_v29  ;;  %3000 = vmatpush3.bf16.msra.mxu1 %v2997_v0  ;;  %v3001_v26 = vpack.c.bf16 %v2412_v25, %v2411_v24  ;;  %v3005_v28 = vpack.c.bf16 %v2414_v37, %v2413_v27  ;;  %v2415_v29 = vld [vmem:[%s3616_s21 + $0x20] sm:$0xff] }
 0xb19   : > { %2990 = vmatprep.subr.bf16.mxu0 %v2989_v32  ;;  %v3009_v31 = vpack.c.bf16 %v2416_v30, %v2415_v29 }
 0xb1c   : > { %2992 = vmatpush3.bf16.msra.mxu0 %v2989_v32  ;;  %v2417_v32 = vld [vmem:[%s3616_s21 + $0x30] sm:$0xff] }
 0xb1d   : > { %3002 = vmatprep.subr.bf16.mxu0 %v3001_v26 }
 0xbe6   : > { %v2164_v33 = vpop.f32.mrb[18].mxu1 }
 0xbe7   : > { %2172 = vrot.lane.b32.xlu0 %v2164_v33, %s3357_s27  ;;  %v2927_v35 = vpop.f32.mrb[19].mxu1  ;;  %v2418_v33 = vld [vmem:[%s3616_s21 + $0x38] sm:$0xff] }
 0xbe8   : > { %v3013_v35 = vpack.c.bf16 %v2418_v33, %v2417_v32 }
 0xbea   : > { %v2088_v38 = vpop.f32.mrb[14].mxu0 }
 0xbeb   : > { %2170 = vrot.lane.b32.xlu1 %v2088_v38, %s3357_s27  ;;  %v2922_v39 = vpop.f32.mrb[15].mxu0  ;;  %v2745_v38 = vld [vmem:[%s563_s3] ss:$0 sm:$0xff]  ;;  %s3358_s3 = smov [#allocation9]  }
 0xbec   : > { %s2520_s2 = sshll.u32 %s3358_s3, 4  ;;  %s2521_s2 = int_to_ptr.vmem [resolvable:$true] %s2520_s2 }
 0xbed   : > { %s3249_s21 = scalar_lea.vmem %s2521_s2, 256  ;;  %p3256_p1 = scmp.lt.s32.totalorder %s2521_s2, %s2521_s2 }
 0xbee   : > { %p3250_p3 = scmp.ne.s32.totalorder %s2521_s2, %s3249_s21  ;;  %p3257_p2 = scmp.lt.s32.totalorder %s3249_s21, %s3249_s21 }
 0xbf0   : > { %p3251_p10 = pnand %p3250_p3, %p3047_p0  ;;  %p3258_p8 = por %p3257_p2, %p3256_p1 }
 0xbf2   : > { %p3252_p12 = pneg %p3251_p10 }
 0xbf4   : > { %p3259_p13 = pnand %p3258_p8, %p3252_p12 }
 0xc59   : > { %v2173_v40 = vpop.permute.xlu0 %2172 }
 0xc5a   : > { %2178 = vst.msk [vmem:[#allocation2 + $0x8] sm:$0xff] %vm2176_vm6, %v2173_v40 }
 0xc5d   : > { %v2171_v41 = vpop.permute.xlu1 %2170 }
 0xc5e   : > { %2177 = vst.msk [vmem:[#allocation2] sm:$0xff] %vm2176_vm6, %v2171_v41 }
 0xc61   : > { %v2180_v43 = vld [vmem:[#allocation2 + $0x8] sm:$0xff] }
 0xc65   : > { %v2179_v42 = vld [vmem:[#allocation2] sm:$0xff] }
 0xc66   : > { %2936 = vmatprep.mubr.msk.f32.mxu0 %vm583_vm1, %v2179_v42 }
 0xc67   : > { %2937 = vmatmul.mubr.msk.f32.vlgmr.msra.gmra.mrb[16].mxu0 %vm583_vm1, %v2180_v43 }
 0xc68   : > { %3004 = vmatpush3.bf16.msra.mxu0 %v3001_v26 }
 0xc69   : > { %3006 = vmatprep.subr.bf16.mxu0 %v3005_v28 }
 0xc6c   : > { %3008 = vmatpush3.bf16.msra.mxu0 %v3005_v28 }
 0xc6d   : > { %3010 = vmatprep.subr.bf16.mxu0 %v3009_v31 }
 0xc70   : > { %3012 = vmatpush3.bf16.msra.mxu0 %v3009_v31 }
 0xc71   : > { %3014 = vmatprep.subr.bf16.mxu0 %v3013_v35 }
 0xc74   : > { %3016 = vmatpush3.bf16.msra.mxu0 %v3013_v35 }
 0xd3a   : > { %v2938_v45 = vpop.f32.mrb[16].mxu0 }
 0xd3b   : > { %v2267_v46 = vadd.f32 %v2938_v45, %v2188_v6  ;;  %v2261_v47 = vpop.f32.mrb[17].mxu0 }
 0xd3c   : > { %v2262_v48 = vadd.f32 %v2261_v47, %v2188_v6 }
 0xd3d   : > { %v3819_v49 = vadd.f32 %v2267_v46, %v3631_v3 }
 0xd3e   : > { %v3822_v50 = vadd.f32 %v2262_v48, %v3629_v2 }
 0xd3f   : > { %v2275_v51 = vsel %vm583_vm1, %v3819_v49, 0.0 }
 0xd40   : > { %2276 = vadd.xlane.f32.xlu0 %v2275_v51  ;;  %v2272_v52 = vsel %vm583_vm1, %v3822_v50, 0.0 }
 0xd41   : > { %2273 = vadd.xlane.f32.xlu1 %v2272_v52 }
 0xdcd   : > { %v2277_v8 = vpop.xlane.xlu0 %2276 }
 0xdce   : > { %v2279_v4 = vmul.f32 0.03125, %v2277_v8  ;;  %v2274_v7 = vpop.xlane.xlu1 %2273 }
 0xdcf   : > { %v2278_v3 = vmul.f32 0.03125, %v2274_v7 }
 0xdd0   : > { %v2281_v53 = vsub.f32 %v3819_v49, %v2279_v4  ;;  %v575_v4 = vld [vmem:[%s3626_s30 + $0x8] sm:$0xff] }
 0xdd1   : > { %v2280_v2 = vsub.f32 %v3822_v50, %v2278_v3  ;;  %v2506_v7 = vrot.slane %v575_v4, %v613_v36 }
 0xdd2   : > { %v2283_v54 = vmul.f32 %v2281_v53, %v2281_v53 }
 0xdd3   : > { %v2282_v55 = vmul.f32 %v2280_v2, %v2280_v2 }
 0xdd4   : > { %v2287_v56 = vsel %vm583_vm1, %v2283_v54, 0.0 }
 0xdd5   : > { %2288 = vadd.xlane.f32.xlu1 %v2287_v56  ;;  %v2284_v57 = vsel %vm583_vm1, %v2282_v55, 0.0 }
 0xdd6   : > { %2285 = vadd.xlane.f32.xlu0 %v2284_v57 }
 0xe62   : > { %v2289_v1 = vpop.xlane.xlu1 %2288 }
 0xe63   : > { %v2291_v5 = vmul.f32 0.03125, %v2289_v1  ;;  %v2286_v9 = vpop.xlane.xlu0 %2285 }
 0xe64   : > { %v2290_v58 = vmul.f32 0.03125, %v2286_v9 }
 0xe65   : > { %v2293_v10 = vadd.f32 1e-05, %v2291_v5 }
 0xe66   : > { %v2292_v11 = vadd.f32 1e-05, %v2290_v58 }
 0xe67   : > { %3155 = vrsqrt.f32 %v2293_v10 }
 0xe68   : > { %3157 = vrsqrt.f32 %v2292_v11 }
 0xe71   : > { %v3156_v15 = vpop.eup %3155 }
 0xe72   : > { %v3158_v16 = vpop.eup %3157  ;;  %v2297_v17 = vmul.f32 %v3156_v15, %v2281_v53 }
 0xe73   : > { %v2296_v22 = vmul.f32 %v3158_v16, %v2280_v2 }
 0xe74   : > { %v2303_v21 = vmul.f32 %v2301_v14, %v2297_v17 }
 0xe75   : > { %v2302_v19 = vmul.f32 %v2301_v14, %v2296_v22 }
 0xe76   : > { %v2309_v23 = vadd.f32 %v2307_v18, %v2303_v21 }
 0xe77   : > { %v2308_v20 = vadd.f32 %v2307_v18, %v2302_v19 }
 0xe79   : > { %2947 = vmatprep.mubr.msk.f32.mxu1 %vm583_vm1, %v2308_v20 }
 0xe7a   : > { %2948 = vmatmul.mubr.msk.f32.vlgmr.msra.gmra.mrb[20].mxu1 %vm583_vm1, %v2309_v23 }
 0xf4d   : > { %v2949_v39 = vpop.f32.mrb[20].mxu1 }
 0xf4e   : > { %v2398_v40 = vadd.f32 %v2949_v39, %v2745_v38  ;;  %v2392_v41 = vpop.f32.mrb[21].mxu1 }
 0xf4f   : > { %v2393_v42 = vadd.f32 %v2745_v38, %v2392_v41 }
 0xf50   : > { %v2404_v43 = vmul.f32 0.70710677, %v2398_v40  ;;  %v2402_v51 = vmul.f32 0.5, %v2398_v40 }
 0xf51   : > { %v2403_v44 = vmul.f32 0.70710677, %v2393_v42  ;;  %v2401_v47 = vmul.f32 0.5, %v2393_v42 }
 0xf52   : > { %3159 = verf.f32 %v2404_v43 }
 0xf53   : > { %3161 = verf.f32 %v2403_v44 }
 0xf5c   : > { %v3160_v6 = vpop.eup %3159 }
 0xf5d   : > { %v3162_v45 = vpop.eup %3161  ;;  %v2408_v46 = vadd.f32 1.0, %v3160_v6 }
 0xf5e   : > { %v2407_v48 = vadd.f32 1.0, %v3162_v45 }
 0xf5f   : > { %v2410_v8 = vmul.f32 %v2408_v46, %v2402_v51 }
 0xf60   : > { %v2409_v52 = vmul.f32 %v2407_v48, %v2401_v47 }
 0xf62   : > { %2966 = vmatprep.mubr.msk.f32.mxu0 %vm2419_vm7, %v2409_v52 }
 0xf63   : > { %2967 = vmatmul.mubr.msk.f32.vlgmr.msra.gmra.mrb[18].mxu0 %vm2419_vm7, %v2410_v8 }
0x1036   : > { %v2968_v3 = vpop.f32.mrb[18].mxu0 }
0x1037   : > { %v2502_v53 = vadd.f32 %v2968_v3, %v3819_v49  ;;  %v2492_v2 = vpop.f32.mrb[19].mxu0 }
0x1038   : > { %v2501_v54 = vadd.f32 %v2492_v2, %v3822_v50 }
0x1039   : > { %v2508_v55 = vadd.f32 %v2506_v7, %v2502_v53 }
0x103a   : > { %v2507_v56 = vadd.f32 %v2506_v7, %v2501_v54 }
0x103b   : > { %2510 = vst.msk [vmem:[#allocation9 + $0x8] sm:$0xff] %vm583_vm1, %v2508_v55 }
0x103c   : > { %2509 = vst.msk [vmem:[#allocation9] sm:$0xff] %vm583_vm1, %v2507_v56 }
0x103d   : > { %3262 = shalt.err (!%p3259_p13)
}
0x103e   : > { %s3952_s16 = sld [smem:[#allocation22_spill]] }
0x1044   : > { %s3953_s9 = smov %s3952_s16  ;;  %s3263_s11 = scalar_lea.hbm %s3952_s16, 256 }
0x1045   : > { %p3264_p4 = scmp.ne.s32.totalorder %s3953_s9, %s3263_s11  ;;  %p3269_p7 = scmp.lt.u32.totalorder %s3263_s11, %s3953_s9 }
0x1047   : > { %p3265_p5 = pnand %p3264_p4, %p3047_p0 }
0x1049   : > { %p3266_p6 = pneg %p3265_p5 }
0x104b   : > { %p3271_p9 = pnand %p3269_p7, %p3266_p6 }
0x104d   : > { %3274 = shalt.err (!%p3271_p9)
}
0x104e   : > { %s3359_s24 = smov 128  }
0x104f   : > { %3028 = dma.vmem_to_hbm [thread:$0]  (%p3047_p0), %s2521_s2, 256, %s3953_s9, [#allocation5], %s3359_s24, %s3359_s24, %s3355_s28  }
0x1050   : > { %3312 = dma.done.wait (%p3047_p0), [#allocation5], 256  }
0x1051   : > { %3314 = vsyncadd (%p3047_p0), [#allocation5], 4294967040 }
0x1052 PF: > { %s23_s18 = sadd.s32 1, %s3337_s18   ;;  %s3954_s27 = sld [smem:[#allocation14_spill]] }
0x1053   : > { %p20_p11 = scmp.ge.s32.totalorder %s23_s18, 4   ;;  %s3955_s13 = smov %s3321_s14 }
0x1054   : > { %s3956_s14 = smov %s3325_s15  ;;  %s3957_s15 = smov %s3539_s8 }
0x1055   : > { %s3958_s16 = smov %s3333_s17  ;;  %22 = sbr.rel (!%p20_p11) target bundleno = 14 (0xe), region = 132 }
0x1058   : > { %s3959_s17 = smov %s3954_s27 }
0x105c   :  { %2536 = vsyncpa [#allocation4], 1 }
0x105d   :  { %2538 = vsyncpa [#allocation4 + $0x1], 1 }
0x105e   :  { %2539 = vsyncpa [#allocation7], 1 }
0x105f   :  { %2540 = vsyncpa [#allocation5], 1 }
0x1060   :  { %2542 = vsyncpa [#allocation5 + $0x1], 1 }

</bundles_post_ra>
